<compile_context>
chip_gen: v7x
topology: tpu7x:2x2x1
jax: 0.10.0
libtpu: 0.0.40
codegen_flags: <defaults>
</compile_context>

<pallas_src>
import functools
import numpy as np
import jax
import jax.numpy as jnp
from jax.experimental import pallas as pl
from jax.experimental.pallas import tpu as pltpu


def _lstm_seq_kernel(x_ref, wih_ref, whh_ref, b_ref, out_ref, hN_ref):
    """One full LSTM sequence (single direction, single layer), all VMEM-resident.

    x_ref:   (B, T, D)  batch-first input
    wih_ref: (D, 4H)    W_ih^T
    whh_ref: (H, 4H)    W_hh^T
    b_ref:   (1, 4H)    b_ih + b_hh
    out_ref: (B, T*H)   per-step hidden states (lane-dense layout)
    hN_ref:  (B, H)     final hidden state
    """
    B, T, D = x_ref.shape
    H = whh_ref.shape[0]

    # Hoisted input projection: one batched MXU matmul for all T timesteps.
    # TODO(synk): on v6e/v7x the matmul operands could be cast to bf16 (f32 accumulate)
    #             for higher MXU throughput; kept f32 here to match the f32 reference.
    x2 = x_ref[...].reshape(B * T, D)                                     # (B*T, D)
    gx = jnp.dot(x2, wih_ref[...], preferred_element_type=jnp.float32)    # (B*T, 4H)
    gx = (gx + b_ref[...]).reshape(B, T, 4 * H)                           # (B, T, 4H)

    whh = whh_ref[...]
    h = jnp.zeros((B, H), jnp.float32)
    c = jnp.zeros((B, H), jnp.float32)
    hs = []
    # T is a small static trip count -> fully unrolled; only the tiny (B,H)@(H,4H)
    # hidden projection remains on the serial critical path.
    for t in range(T):
        g = gx[:, t, :] + jnp.dot(h, whh, preferred_element_type=jnp.float32)  # (B, 4H)
        sig = jax.nn.sigmoid(g)            # whole-vreg sigmoid; slice i/f/o out of it
        i_g = sig[:, 0 * H:1 * H]
        f_g = sig[:, 1 * H:2 * H]
        o_g = sig[:, 3 * H:4 * H]
        g_g = jnp.tanh(g[:, 2 * H:3 * H])
        c = f_g * c + i_g * g_g
        h = o_g * jnp.tanh(c)
        hs.append(h)

    # Single lane-dense writeback of the whole output slab.
    out_ref[...] = jnp.concatenate(hs, axis=-1).astype(out_ref.dtype)     # (B, T*H)
    hN_ref[...] = h.astype(hN_ref.dtype)


def lstm_layer_pallas(x_btd, w_ih_t, w_hh_t, bias):
    """Single-direction, single-layer LSTM.

    x_btd:  (B, T, D) float32  (batch-first, as PyTorch batch_first=True)
    w_ih_t: (D, 4H)   float32  (PyTorch weight_ih transposed)
    w_hh_t: (H, 4H)   float32  (PyTorch weight_hh transposed)
    bias:   (1, 4H)   float32  (b_ih + b_hh)
    returns: output (B, T, H), h_n (B, H)
    """
    B, T, D = x_btd.shape
    H = w_hh_t.shape[0]
    # TODO(synk): for large H/T the resident weights + precomputed-gate buffer should be
    #             tiled against v7x's 64 MiB VMEM (grid over 4H / T chunks); not needed here.
    out_flat, h_n = pl.pallas_call(
        _lstm_seq_kernel,
        out_shape=(
            jax.ShapeDtypeStruct((B, T * H), jnp.float32),
            jax.ShapeDtypeStruct((B, H), jnp.float32),
        ),
        in_specs=[
            pl.BlockSpec(memory_space=pltpu.MemorySpace.VMEM),   # x (whole array resident)
            pl.BlockSpec(memory_space=pltpu.MemorySpace.VMEM),   # W_ih^T
            pl.BlockSpec(memory_space=pltpu.MemorySpace.VMEM),   # W_hh^T
            pl.BlockSpec(memory_space=pltpu.MemorySpace.VMEM),   # bias
        ],
        out_specs=(
            pl.BlockSpec(memory_space=pltpu.MemorySpace.VMEM),   # (B, T*H) output slab
            pl.BlockSpec(memory_space=pltpu.MemorySpace.VMEM),   # (B, H) final hidden
        ),
    )(x_btd, w_ih_t, w_hh_t, bias)
    return out_flat.reshape(B, T, H), h_n


def init_full_rnn_params(key, in_dim, num_hidden, num_layer, bidirect):
    """Deterministic PyTorch-style init: U(-1/sqrt(H), 1/sqrt(H))."""
    num_dir = 1 + int(bidirect)
    k = 1.0 / np.sqrt(num_hidden)
    params = {}
    for layer in range(num_layer):
        d_in = in_dim if layer == 0 else num_hidden * num_dir
        for d in range(num_dir):
            key, k1, k2, k3, k4 = jax.random.split(key, 5)
            w_ih = jax.random.uniform(k1, (4 * num_hidden, d_in), jnp.float32, -k, k)
            w_hh = jax.random.uniform(k2, (4 * num_hidden, num_hidden), jnp.float32, -k, k)
            b_ih = jax.random.uniform(k3, (4 * num_hidden,), jnp.float32, -k, k)
            b_hh = jax.random.uniform(k4, (4 * num_hidden,), jnp.float32, -k, k)
            params[(layer, d)] = (w_ih.T, w_hh.T, (b_ih + b_hh)[None, :])
    return params


def full_rnn_forward(x, params, num_layer, bidirect, layer_fn=lstm_layer_pallas):
    """Replicates Full_RNN.forward: output, hidden = rnn(x, zeros); hidden = h_n.squeeze()."""
    # TODO(synk): nn.LSTM inter-layer dropout is not applied; this is the eval-mode forward.
    # TODO(synk): on v7x the two directions of a bidirectional layer could be sharded across
    #             the two TensorCores (pl.core_map / parallel leading axis); run serially here.
    num_dir = 1 + int(bidirect)
    h_list = []
    layer_in = x
    for layer in range(num_layer):
        dir_outs = []
        for d in range(num_dir):
            w_ih_t, w_hh_t, bias = params[(layer, d)]
            xi = layer_in if d == 0 else jnp.flip(layer_in, axis=1)
            out, h_n = layer_fn(xi, w_ih_t, w_hh_t, bias)
            if d == 1:
                out = jnp.flip(out, axis=1)
            dir_outs.append(out)
            h_list.append(h_n)                     # PyTorch h_n order: layer*num_dir + dir
        layer_in = dir_outs[0] if num_dir == 1 else jnp.concatenate(dir_outs, axis=-1)
    output = layer_in                              # (B, T, H*num_dir)
    hidden = jnp.squeeze(jnp.stack(h_list, axis=0))  # like hidden[0].squeeze()
    return output, hidden


def _lstm_layer_ref(x_btd, w_ih_t, w_hh_t, bias):
    """Pure-JAX reference (lax.scan) for correctness checking."""
    B, T, D = x_btd.shape
    H = w_hh_t.shape[0]

    def step(carry, x_t):
        h, c = carry
        g = x_t @ w_ih_t + h @ w_hh_t + bias
        i, f, gg, o = (jax.nn.sigmoid(g[:, :H]), jax.nn.sigmoid(g[:, H:2 * H]),
                       jnp.tanh(g[:, 2 * H:3 * H]), jax.nn.sigmoid(g[:, 3 * H:]))
        c = f * c + i * gg
        h = o * jnp.tanh(c)
        return (h, c), h

    (h, _), ys = jax.lax.scan(step, (jnp.zeros((B, H)), jnp.zeros((B, H))),
                              jnp.transpose(x_btd, (1, 0, 2)))
    return jnp.transpose(ys, (1, 0, 2)), h


if __name__ == "__main__":
    key = jax.random.PRNGKey(0)

    # Config 1: Full_RNN(in_dim=32, num_hidden=32, num_layer=1, bidirect=False, dropout=0.0)
    in_dim, num_hidden, num_layer, bidirect = 32, 32, 1, False
    B, T = 8, 8
    key, kx, kp = jax.random.split(key, 3)
    x = jax.random.normal(kx, (B, T, in_dim), jnp.float32)
    params = init_full_rnn_params(kp, in_dim, num_hidden, num_layer, bidirect)

    fwd = jax.jit(functools.partial(full_rnn_forward,
                                    num_layer=num_layer, bidirect=bidirect))
    output, hidden = fwd(x, params)
    jax.block_until_ready((output, hidden))

    ref_out, ref_h = full_rnn_forward(x, params, num_layer, bidirect,
                                      layer_fn=_lstm_layer_ref)
    assert output.shape == (B, T, num_hidden) and hidden.shape == (B, num_hidden)
    assert np.allclose(np.asarray(output), np.asarray(ref_out), atol=2e-4)
    assert np.allclose(np.asarray(hidden), np.asarray(ref_h), atol=2e-4)

    # Config 2: 2-layer bidirectional — exercises multi-layer / reversed-direction path.
    in_dim2, num_hidden2, num_layer2, bidirect2 = 32, 32, 2, True
    key, kx2, kp2 = jax.random.split(key, 3)
    x2 = jax.random.normal(kx2, (B, T, in_dim2), jnp.float32)
    params2 = init_full_rnn_params(kp2, in_dim2, num_hidden2, num_layer2, bidirect2)

    fwd2 = jax.jit(functools.partial(full_rnn_forward,
                                     num_layer=num_layer2, bidirect=bidirect2))
    output2, hidden2 = fwd2(x2, params2)
    jax.block_until_ready((output2, hidden2))

    ref_out2, ref_h2 = full_rnn_forward(x2, params2, num_layer2, bidirect2,
                                        layer_fn=_lstm_layer_ref)
    assert output2.shape == (B, T, 2 * num_hidden2)
    assert hidden2.shape == (2 * num_layer2, B, num_hidden2)
    assert np.allclose(np.asarray(output2), np.asarray(ref_out2), atol=3e-4)
    assert np.allclose(np.asarray(hidden2), np.asarray(ref_h2), atol=3e-4)

    print("KERNEL_OK")
</pallas_src>

<mosaic_0001>
module attributes {stable_mosaic.version = 11 : i64} {
  func.func @_lstm_seq_kernel(%arg0: memref<8x8x32xf32, #tpu.memory_space<vmem>>, %arg1: memref<32x128xf32, #tpu.memory_space<vmem>>, %arg2: memref<32x128xf32, #tpu.memory_space<vmem>>, %arg3: memref<1x128xf32, #tpu.memory_space<vmem>>, %arg4: memref<8x256xf32, #tpu.memory_space<vmem>>, %arg5: memref<8x32xf32, #tpu.memory_space<vmem>>) attributes {dimension_semantics = [], scalar_prefetch = 0 : i64, scratch_operands = 0 : i64, tpu.core_type = #tpu.core_type<tc>} {
    %c0 = arith.constant 0 : index
    %c0_0 = arith.constant 0 : index
    %c0_1 = arith.constant 0 : index
    %0 = vector.load %arg0[%c0, %c0_0, %c0_1] : memref<8x8x32xf32, #tpu.memory_space<vmem>>, vector<8x8x32xf32>
    %1 = vector.shape_cast %0 : vector<8x8x32xf32> to vector<64x32xf32>
    %c0_2 = arith.constant 0 : index
    %c0_3 = arith.constant 0 : index
    %2 = vector.load %arg1[%c0_2, %c0_3] : memref<32x128xf32, #tpu.memory_space<vmem>>, vector<32x128xf32>
    %cst = arith.constant dense<0.000000e+00> : vector<64x128xf32>
    %3 = tpu.matmul %1, %2, %cst {dimension_numbers = #tpu.dot_dimension_numbers<[1], [0], [0], [1], [0, 0, 1, 1], [], []>} : vector<64x32xf32>, vector<32x128xf32>, vector<64x128xf32> -> vector<64x128xf32>
    %c0_4 = arith.constant 0 : index
    %c0_5 = arith.constant 0 : index
    %4 = vector.load %arg3[%c0_4, %c0_5] : memref<1x128xf32, #tpu.memory_space<vmem>>, vector<1x128xf32>
    %5 = vector.broadcast %4 : vector<1x128xf32> to vector<64x128xf32>
    %6 = arith.addf %3, %5 : vector<64x128xf32>
    %7 = vector.shape_cast %6 : vector<64x128xf32> to vector<8x8x128xf32>
    %c0_6 = arith.constant 0 : index
    %c0_7 = arith.constant 0 : index
    %8 = vector.load %arg2[%c0_6, %c0_7] : memref<32x128xf32, #tpu.memory_space<vmem>>, vector<32x128xf32>
    %cst_8 = arith.constant 0.000000e+00 : f32
    %9 = vector.broadcast %cst_8 : f32 to vector<8x32xf32>
    %cst_9 = arith.constant 0.000000e+00 : f32
    %10 = vector.broadcast %cst_9 : f32 to vector<8x32xf32>
    %11 = vector.extract_strided_slice %7 {offsets = [0, 0, 0], sizes = [8, 1, 128], strides = [1, 1, 1]} : vector<8x8x128xf32> to vector<8x1x128xf32>
    %12 = vector.shape_cast %11 : vector<8x1x128xf32> to vector<8x128xf32>
    %cst_10 = arith.constant dense<0.000000e+00> : vector<8x128xf32>
    %13 = tpu.matmul %9, %8, %cst_10 {dimension_numbers = #tpu.dot_dimension_numbers<[1], [0], [0], [1], [0, 0, 1, 1], [], []>} : vector<8x32xf32>, vector<32x128xf32>, vector<8x128xf32> -> vector<8x128xf32>
    %14 = arith.addf %12, %13 : vector<8x128xf32>
    %15 = arith.negf %14 : vector<8x128xf32>
    %16 = math.exp %15 : vector<8x128xf32>
    %cst_11 = arith.constant 1.000000e+00 : f32
    %17 = vector.broadcast %cst_11 : f32 to vector<8x128xf32>
    %18 = arith.addf %17, %16 : vector<8x128xf32>
    %19 = arith.divf %17, %18 : vector<8x128xf32>
    %20 = vector.extract_strided_slice %19 {offsets = [0, 0], sizes = [8, 32], strides = [1, 1]} : vector<8x128xf32> to vector<8x32xf32>
    %21 = vector.extract_strided_slice %19 {offsets = [0, 32], sizes = [8, 32], strides = [1, 1]} : vector<8x128xf32> to vector<8x32xf32>
    %22 = vector.extract_strided_slice %19 {offsets = [0, 96], sizes = [8, 32], strides = [1, 1]} : vector<8x128xf32> to vector<8x32xf32>
    %23 = vector.extract_strided_slice %14 {offsets = [0, 64], sizes = [8, 32], strides = [1, 1]} : vector<8x128xf32> to vector<8x32xf32>
    %24 = math.tanh %23 : vector<8x32xf32>
    %25 = arith.mulf %21, %10 : vector<8x32xf32>
    %26 = arith.mulf %20, %24 : vector<8x32xf32>
    %27 = arith.addf %25, %26 : vector<8x32xf32>
    %28 = math.tanh %27 : vector<8x32xf32>
    %29 = arith.mulf %22, %28 : vector<8x32xf32>
    %30 = vector.extract_strided_slice %7 {offsets = [0, 1, 0], sizes = [8, 1, 128], strides = [1, 1, 1]} : vector<8x8x128xf32> to vector<8x1x128xf32>
    %31 = vector.shape_cast %30 : vector<8x1x128xf32> to vector<8x128xf32>
    %cst_12 = arith.constant dense<0.000000e+00> : vector<8x128xf32>
    %32 = tpu.matmul %29, %8, %cst_12 {dimension_numbers = #tpu.dot_dimension_numbers<[1], [0], [0], [1], [0, 0, 1, 1], [], []>} : vector<8x32xf32>, vector<32x128xf32>, vector<8x128xf32> -> vector<8x128xf32>
    %33 = arith.addf %31, %32 : vector<8x128xf32>
    %34 = arith.negf %33 : vector<8x128xf32>
    %35 = math.exp %34 : vector<8x128xf32>
    %cst_13 = arith.constant 1.000000e+00 : f32
    %36 = vector.broadcast %cst_13 : f32 to vector<8x128xf32>
    %37 = arith.addf %36, %35 : vector<8x128xf32>
    %38 = arith.divf %36, %37 : vector<8x128xf32>
    %39 = vector.extract_strided_slice %38 {offsets = [0, 0], sizes = [8, 32], strides = [1, 1]} : vector<8x128xf32> to vector<8x32xf32>
    %40 = vector.extract_strided_slice %38 {offsets = [0, 32], sizes = [8, 32], strides = [1, 1]} : vector<8x128xf32> to vector<8x32xf32>
    %41 = vector.extract_strided_slice %38 {offsets = [0, 96], sizes = [8, 32], strides = [1, 1]} : vector<8x128xf32> to vector<8x32xf32>
    %42 = vector.extract_strided_slice %33 {offsets = [0, 64], sizes = [8, 32], strides = [1, 1]} : vector<8x128xf32> to vector<8x32xf32>
    %43 = math.tanh %42 : vector<8x32xf32>
    %44 = arith.mulf %40, %27 : vector<8x32xf32>
    %45 = arith.mulf %39, %43 : vector<8x32xf32>
    %46 = arith.addf %44, %45 : vector<8x32xf32>
    %47 = math.tanh %46 : vector<8x32xf32>
    %48 = arith.mulf %41, %47 : vector<8x32xf32>
    %49 = vector.extract_strided_slice %7 {offsets = [0, 2, 0], sizes = [8, 1, 128], strides = [1, 1, 1]} : vector<8x8x128xf32> to vector<8x1x128xf32>
    %50 = vector.shape_cast %49 : vector<8x1x128xf32> to vector<8x128xf32>
    %cst_14 = arith.constant dense<0.000000e+00> : vector<8x128xf32>
    %51 = tpu.matmul %48, %8, %cst_14 {dimension_numbers = #tpu.dot_dimension_numbers<[1], [0], [0], [1], [0, 0, 1, 1], [], []>} : vector<8x32xf32>, vector<32x128xf32>, vector<8x128xf32> -> vector<8x128xf32>
    %52 = arith.addf %50, %51 : vector<8x128xf32>
    %53 = arith.negf %52 : vector<8x128xf32>
    %54 = math.exp %53 : vector<8x128xf32>
    %cst_15 = arith.constant 1.000000e+00 : f32
    %55 = vector.broadcast %cst_15 : f32 to vector<8x128xf32>
    %56 = arith.addf %55, %54 : vector<8x128xf32>
    %57 = arith.divf %55, %56 : vector<8x128xf32>
    %58 = vector.extract_strided_slice %57 {offsets = [0, 0], sizes = [8, 32], strides = [1, 1]} : vector<8x128xf32> to vector<8x32xf32>
    %59 = vector.extract_strided_slice %57 {offsets = [0, 32], sizes = [8, 32], strides = [1, 1]} : vector<8x128xf32> to vector<8x32xf32>
    %60 = vector.extract_strided_slice %57 {offsets = [0, 96], sizes = [8, 32], strides = [1, 1]} : vector<8x128xf32> to vector<8x32xf32>
    %61 = vector.extract_strided_slice %52 {offsets = [0, 64], sizes = [8, 32], strides = [1, 1]} : vector<8x128xf32> to vector<8x32xf32>
    %62 = math.tanh %61 : vector<8x32xf32>
    %63 = arith.mulf %59, %46 : vector<8x32xf32>
    %64 = arith.mulf %58, %62 : vector<8x32xf32>
    %65 = arith.addf %63, %64 : vector<8x32xf32>
    %66 = math.tanh %65 : vector<8x32xf32>
    %67 = arith.mulf %60, %66 : vector<8x32xf32>
    %68 = vector.extract_strided_slice %7 {offsets = [0, 3, 0], sizes = [8, 1, 128], strides = [1, 1, 1]} : vector<8x8x128xf32> to vector<8x1x128xf32>
    %69 = vector.shape_cast %68 : vector<8x1x128xf32> to vector<8x128xf32>
    %cst_16 = arith.constant dense<0.000000e+00> : vector<8x128xf32>
    %70 = tpu.matmul %67, %8, %cst_16 {dimension_numbers = #tpu.dot_dimension_numbers<[1], [0], [0], [1], [0, 0, 1, 1], [], []>} : vector<8x32xf32>, vector<32x128xf32>, vector<8x128xf32> -> vector<8x128xf32>
    %71 = arith.addf %69, %70 : vector<8x128xf32>
    %72 = arith.negf %71 : vector<8x128xf32>
    %73 = math.exp %72 : vector<8x128xf32>
    %cst_17 = arith.constant 1.000000e+00 : f32
    %74 = vector.broadcast %cst_17 : f32 to vector<8x128xf32>
    %75 = arith.addf %74, %73 : vector<8x128xf32>
    %76 = arith.divf %74, %75 : vector<8x128xf32>
    %77 = vector.extract_strided_slice %76 {offsets = [0, 0], sizes = [8, 32], strides = [1, 1]} : vector<8x128xf32> to vector<8x32xf32>
    %78 = vector.extract_strided_slice %76 {offsets = [0, 32], sizes = [8, 32], strides = [1, 1]} : vector<8x128xf32> to vector<8x32xf32>
    %79 = vector.extract_strided_slice %76 {offsets = [0, 96], sizes = [8, 32], strides = [1, 1]} : vector<8x128xf32> to vector<8x32xf32>
    %80 = vector.extract_strided_slice %71 {offsets = [0, 64], sizes = [8, 32], strides = [1, 1]} : vector<8x128xf32> to vector<8x32xf32>
    %81 = math.tanh %80 : vector<8x32xf32>
    %82 = arith.mulf %78, %65 : vector<8x32xf32>
    %83 = arith.mulf %77, %81 : vector<8x32xf32>
    %84 = arith.addf %82, %83 : vector<8x32xf32>
    %85 = math.tanh %84 : vector<8x32xf32>
    %86 = arith.mulf %79, %85 : vector<8x32xf32>
    %87 = vector.extract_strided_slice %7 {offsets = [0, 4, 0], sizes = [8, 1, 128], strides = [1, 1, 1]} : vector<8x8x128xf32> to vector<8x1x128xf32>
    %88 = vector.shape_cast %87 : vector<8x1x128xf32> to vector<8x128xf32>
    %cst_18 = arith.constant dense<0.000000e+00> : vector<8x128xf32>
    %89 = tpu.matmul %86, %8, %cst_18 {dimension_numbers = #tpu.dot_dimension_numbers<[1], [0], [0], [1], [0, 0, 1, 1], [], []>} : vector<8x32xf32>, vector<32x128xf32>, vector<8x128xf32> -> vector<8x128xf32>
    %90 = arith.addf %88, %89 : vector<8x128xf32>
    %91 = arith.negf %90 : vector<8x128xf32>
    %92 = math.exp %91 : vector<8x128xf32>
    %cst_19 = arith.constant 1.000000e+00 : f32
    %93 = vector.broadcast %cst_19 : f32 to vector<8x128xf32>
    %94 = arith.addf %93, %92 : vector<8x128xf32>
    %95 = arith.divf %93, %94 : vector<8x128xf32>
    %96 = vector.extract_strided_slice %95 {offsets = [0, 0], sizes = [8, 32], strides = [1, 1]} : vector<8x128xf32> to vector<8x32xf32>
    %97 = vector.extract_strided_slice %95 {offsets = [0, 32], sizes = [8, 32], strides = [1, 1]} : vector<8x128xf32> to vector<8x32xf32>
    %98 = vector.extract_strided_slice %95 {offsets = [0, 96], sizes = [8, 32], strides = [1, 1]} : vector<8x128xf32> to vector<8x32xf32>
    %99 = vector.extract_strided_slice %90 {offsets = [0, 64], sizes = [8, 32], strides = [1, 1]} : vector<8x128xf32> to vector<8x32xf32>
    %100 = math.tanh %99 : vector<8x32xf32>
    %101 = arith.mulf %97, %84 : vector<8x32xf32>
    %102 = arith.mulf %96, %100 : vector<8x32xf32>
    %103 = arith.addf %101, %102 : vector<8x32xf32>
    %104 = math.tanh %103 : vector<8x32xf32>
    %105 = arith.mulf %98, %104 : vector<8x32xf32>
    %106 = vector.extract_strided_slice %7 {offsets = [0, 5, 0], sizes = [8, 1, 128], strides = [1, 1, 1]} : vector<8x8x128xf32> to vector<8x1x128xf32>
    %107 = vector.shape_cast %106 : vector<8x1x128xf32> to vector<8x128xf32>
    %cst_20 = arith.constant dense<0.000000e+00> : vector<8x128xf32>
    %108 = tpu.matmul %105, %8, %cst_20 {dimension_numbers = #tpu.dot_dimension_numbers<[1], [0], [0], [1], [0, 0, 1, 1], [], []>} : vector<8x32xf32>, vector<32x128xf32>, vector<8x128xf32> -> vector<8x128xf32>
    %109 = arith.addf %107, %108 : vector<8x128xf32>
    %110 = arith.negf %109 : vector<8x128xf32>
    %111 = math.exp %110 : vector<8x128xf32>
    %cst_21 = arith.constant 1.000000e+00 : f32
    %112 = vector.broadcast %cst_21 : f32 to vector<8x128xf32>
    %113 = arith.addf %112, %111 : vector<8x128xf32>
    %114 = arith.divf %112, %113 : vector<8x128xf32>
    %115 = vector.extract_strided_slice %114 {offsets = [0, 0], sizes = [8, 32], strides = [1, 1]} : vector<8x128xf32> to vector<8x32xf32>
    %116 = vector.extract_strided_slice %114 {offsets = [0, 32], sizes = [8, 32], strides = [1, 1]} : vector<8x128xf32> to vector<8x32xf32>
    %117 = vector.extract_strided_slice %114 {offsets = [0, 96], sizes = [8, 32], strides = [1, 1]} : vector<8x128xf32> to vector<8x32xf32>
    %118 = vector.extract_strided_slice %109 {offsets = [0, 64], sizes = [8, 32], strides = [1, 1]} : vector<8x128xf32> to vector<8x32xf32>
    %119 = math.tanh %118 : vector<8x32xf32>
    %120 = arith.mulf %116, %103 : vector<8x32xf32>
    %121 = arith.mulf %115, %119 : vector<8x32xf32>
    %122 = arith.addf %120, %121 : vector<8x32xf32>
    %123 = math.tanh %122 : vector<8x32xf32>
    %124 = arith.mulf %117, %123 : vector<8x32xf32>
    %125 = vector.extract_strided_slice %7 {offsets = [0, 6, 0], sizes = [8, 1, 128], strides = [1, 1, 1]} : vector<8x8x128xf32> to vector<8x1x128xf32>
    %126 = vector.shape_cast %125 : vector<8x1x128xf32> to vector<8x128xf32>
    %cst_22 = arith.constant dense<0.000000e+00> : vector<8x128xf32>
    %127 = tpu.matmul %124, %8, %cst_22 {dimension_numbers = #tpu.dot_dimension_numbers<[1], [0], [0], [1], [0, 0, 1, 1], [], []>} : vector<8x32xf32>, vector<32x128xf32>, vector<8x128xf32> -> vector<8x128xf32>
    %128 = arith.addf %126, %127 : vector<8x128xf32>
    %129 = arith.negf %128 : vector<8x128xf32>
    %130 = math.exp %129 : vector<8x128xf32>
    %cst_23 = arith.constant 1.000000e+00 : f32
    %131 = vector.broadcast %cst_23 : f32 to vector<8x128xf32>
    %132 = arith.addf %131, %130 : vector<8x128xf32>
    %133 = arith.divf %131, %132 : vector<8x128xf32>
    %134 = vector.extract_strided_slice %133 {offsets = [0, 0], sizes = [8, 32], strides = [1, 1]} : vector<8x128xf32> to vector<8x32xf32>
    %135 = vector.extract_strided_slice %133 {offsets = [0, 32], sizes = [8, 32], strides = [1, 1]} : vector<8x128xf32> to vector<8x32xf32>
    %136 = vector.extract_strided_slice %133 {offsets = [0, 96], sizes = [8, 32], strides = [1, 1]} : vector<8x128xf32> to vector<8x32xf32>
    %137 = vector.extract_strided_slice %128 {offsets = [0, 64], sizes = [8, 32], strides = [1, 1]} : vector<8x128xf32> to vector<8x32xf32>
    %138 = math.tanh %137 : vector<8x32xf32>
    %139 = arith.mulf %135, %122 : vector<8x32xf32>
    %140 = arith.mulf %134, %138 : vector<8x32xf32>
    %141 = arith.addf %139, %140 : vector<8x32xf32>
    %142 = math.tanh %141 : vector<8x32xf32>
    %143 = arith.mulf %136, %142 : vector<8x32xf32>
    %144 = vector.extract_strided_slice %7 {offsets = [0, 7, 0], sizes = [8, 1, 128], strides = [1, 1, 1]} : vector<8x8x128xf32> to vector<8x1x128xf32>
    %145 = vector.shape_cast %144 : vector<8x1x128xf32> to vector<8x128xf32>
    %cst_24 = arith.constant dense<0.000000e+00> : vector<8x128xf32>
    %146 = tpu.matmul %143, %8, %cst_24 {dimension_numbers = #tpu.dot_dimension_numbers<[1], [0], [0], [1], [0, 0, 1, 1], [], []>} : vector<8x32xf32>, vector<32x128xf32>, vector<8x128xf32> -> vector<8x128xf32>
    %147 = arith.addf %145, %146 : vector<8x128xf32>
    %148 = arith.negf %147 : vector<8x128xf32>
    %149 = math.exp %148 : vector<8x128xf32>
    %cst_25 = arith.constant 1.000000e+00 : f32
    %150 = vector.broadcast %cst_25 : f32 to vector<8x128xf32>
    %151 = arith.addf %150, %149 : vector<8x128xf32>
    %152 = arith.divf %150, %151 : vector<8x128xf32>
    %153 = vector.extract_strided_slice %152 {offsets = [0, 0], sizes = [8, 32], strides = [1, 1]} : vector<8x128xf32> to vector<8x32xf32>
    %154 = vector.extract_strided_slice %152 {offsets = [0, 32], sizes = [8, 32], strides = [1, 1]} : vector<8x128xf32> to vector<8x32xf32>
    %155 = vector.extract_strided_slice %152 {offsets = [0, 96], sizes = [8, 32], strides = [1, 1]} : vector<8x128xf32> to vector<8x32xf32>
    %156 = vector.extract_strided_slice %147 {offsets = [0, 64], sizes = [8, 32], strides = [1, 1]} : vector<8x128xf32> to vector<8x32xf32>
    %157 = math.tanh %156 : vector<8x32xf32>
    %158 = arith.mulf %154, %141 : vector<8x32xf32>
    %159 = arith.mulf %153, %157 : vector<8x32xf32>
    %160 = arith.addf %158, %159 : vector<8x32xf32>
    %161 = math.tanh %160 : vector<8x32xf32>
    %162 = arith.mulf %155, %161 : vector<8x32xf32>
    %163 = tpu.concatenate %29, %48, %67, %86, %105, %124, %143, %162 in 1 : vector<8x32xf32>, vector<8x32xf32>, vector<8x32xf32>, vector<8x32xf32>, vector<8x32xf32>, vector<8x32xf32>, vector<8x32xf32>, vector<8x32xf32> -> vector<8x256xf32>
    %c0_26 = arith.constant 0 : index
    %c0_27 = arith.constant 0 : index
    %164 = vector.load %arg4[%c0_26, %c0_27] : memref<8x256xf32, #tpu.memory_space<vmem>>, vector<8x256xf32>
    tpu.vector_store %arg4[%c0_26, %c0_27], %163 {strides = array<i32>} : memref<8x256xf32, #tpu.memory_space<vmem>>, vector<8x256xf32>,
    %c0_28 = arith.constant 0 : index
    %c0_29 = arith.constant 0 : index
    %165 = vector.load %arg5[%c0_28, %c0_29] : memref<8x32xf32, #tpu.memory_space<vmem>>, vector<8x32xf32>
    tpu.vector_store %arg5[%c0_28, %c0_29], %162 {strides = array<i32>} : memref<8x32xf32, #tpu.memory_space<vmem>>, vector<8x32xf32>,
    return
  }
}

</mosaic_0001>

<bundles_post_ra>
// kernel: full_rnn_forward.1
= control target key start
LH: loop header
LB: loop body
LE: loop exit
PB: predicated region body
PF: predicated region fallthrough
CT: control target
= control target key end

     0   :  { %11 = vsyncpa [#allocation3], 0  ;;  %s4973_s0 = inlined_call_operand.hbm [shape: f32[8,8,32], index: 0, kind: input, shape index: {}]   ;;  %s4974_s1 = inlined_call_operand.hbm [shape: f32[32,128], index: 1, kind: input, shape index: {}]   ;;  %s4975_s2 = inlined_call_operand.hbm [shape: f32[32,128], index: 2, kind: input, shape index: {}]   ;;  %s4976_s3 = inlined_call_operand.vmem [shape: f32[1,128], index: 3, kind: input, shape index: {}]   ;;  %s4977_s4 = inlined_call_operand.vmem [shape: f32[8,256], index: 4, kind: output, shape index: {0}]   ;;  %s4978_s5 = inlined_call_operand.hbm [shape: f32[8,32], index: 5, kind: output, shape index: {1}]  }
   0x1   :  { %12 = vsyncpa [#allocation6], 0 }
   0x2   :  { %13 = vsyncpa [#allocation4], 0  ;;  %s3867_s18 = smov [#allocation5]   ;;  %s3868_s20 = smov [#allocation2]  }
   0x3   :  { %s31_s19 = sshll.u32 %s3867_s18, 4  ;;  %s19_s21 = sshll.u32 %s3868_s20, 4  ;;  %s32_s19 = int_to_ptr.vmem [resolvable:$true] %s31_s19  ;;  %s3909_s21 = int_to_ptr.vmem [resolvable:$true] %s19_s21 }
   0x4   :  { %s3773_s24 = scalar_lea.hbm %s4974_s1, 512 }
   0x5   :  { %p3774_p0 = scmp.ne.s32.totalorder %s4974_s1, %s3773_s24  ;;  %p3777_p1 = scmp.lt.u32.totalorder %s3773_s24, %s4974_s1 }
   0x7   :  { %p3779_p2 = pnand %p3777_p1, %p3774_p0 }
   0x9   :  { %3782 = shalt.err (!%p3779_p2)
}
   0xa   :  { %s3783_s29 = scalar_lea.vmem %s32_s19, 512  ;;  %p3788_p4 = scmp.lt.s32.totalorder %s32_s19, %s32_s19 }
   0xb   :  { %p3784_p3 = scmp.ne.s32.totalorder %s32_s19, %s3783_s29  ;;  %p3789_p5 = scmp.lt.s32.totalorder %s3783_s29, %s3783_s29 }
   0xd   :  { %p3790_p6 = por %p3789_p5, %p3788_p4 }
   0xf   :  { %p3791_p7 = pnand %p3790_p6, %p3784_p3 }
  0x11   :  { %3794 = shalt.err (!%p3791_p7)
}
  0x12   :  { %s3869_s30 = smov 128   ;;  %s3870_s6 = smov 8  }
  0x13   :  { %37 = dma.hbm_to_vmem [thread:$0]  %s4974_s1, 512, %s32_s19, [#allocation6], %s3869_s30, %s3869_s30, %s3870_s6  }
  0x14   :  { %s3795_s11 = scalar_lea.hbm %s4973_s0, 1024 }
  0x15   :  { %p3796_p8 = scmp.ne.s32.totalorder %s4973_s0, %s3795_s11  ;;  %p3799_p9 = scmp.lt.u32.totalorder %s3795_s11, %s4973_s0 }
  0x17   :  { %p3801_p10 = pnand %p3799_p9, %p3796_p8 }
  0x19   :  { %3804 = shalt.err (!%p3801_p10)
}
  0x1a   :  { %s3805_s16 = scalar_lea.vmem %s3909_s21, 1024  ;;  %p3810_p12 = scmp.lt.s32.totalorder %s3909_s21, %s3909_s21 }
  0x1b   :  { %p3806_p11 = scmp.ne.s32.totalorder %s3909_s21, %s3805_s16  ;;  %p3811_p13 = scmp.lt.s32.totalorder %s3805_s16, %s3805_s16 }
  0x1d   :  { %p3812_p0 = por %p3811_p13, %p3810_p12 }
  0x1f   :  { %p3813_p1 = pnand %p3812_p0, %p3806_p11 }
  0x21   :  { %3816 = shalt.err (!%p3813_p1)
}
  0x22   :  { %25 = dma.hbm_to_vmem [thread:$0]  %s4973_s0, 1024, %s3909_s21, [#allocation3], %s3869_s30, %s3869_s30, %s3870_s6  }
  0x23   :  { %s3871_s18 = smov [#allocation7]   ;;  %s3817_s23 = scalar_lea.hbm %s4975_s2, 512 }
  0x24   :  { %s43_s19 = sshll.u32 %s3871_s18, 4  ;;  %p3818_p2 = scmp.ne.s32.totalorder %s4975_s2, %s3817_s23  ;;  %s44_s19 = int_to_ptr.vmem [resolvable:$true] %s43_s19 }
  0x25   :  { %p3821_p3 = scmp.lt.u32.totalorder %s3817_s23, %s4975_s2 }
  0x27   :  { %p3823_p4 = pnand %p3821_p3, %p3818_p2 }
  0x29   :  { %3826 = shalt.err (!%p3823_p4)
}
  0x2a   :  { %s3827_s28 = scalar_lea.vmem %s44_s19, 512  ;;  %p3832_p6 = scmp.lt.s32.totalorder %s44_s19, %s44_s19 }
  0x2b   :  { %p3828_p5 = scmp.ne.s32.totalorder %s44_s19, %s3827_s28  ;;  %p3833_p7 = scmp.lt.s32.totalorder %s3827_s28, %s3827_s28 }
  0x2d   :  { %p3834_p8 = por %p3833_p7, %p3832_p6 }
  0x2f   :  { %p3835_p9 = pnand %p3834_p8, %p3828_p5 }
  0x31   :  { %3838 = shalt.err (!%p3835_p9)
}
  0x32   :  { %49 = dma.hbm_to_vmem [thread:$0]  %s4975_s2, 512, %s44_s19, [#allocation6], %s3869_s30, %s3869_s30, %s3870_s6  }
  0x33   :  { %3861 = dma.done.wait [#allocation3], 1024  }
  0x34   :  { %3862 = vsyncadd [#allocation3], 4294966272 }
  0x35   :  { %3863 = dma.done.wait [#allocation6], 1024  }
  0x36   :  { %3864 = vsyncadd [#allocation6], 4294966272  ;;  %v3872_v0 = vmov 0.0|0.0   ;;  %vm3873_vm0 = vmmov 0   ;;  %v3874_v1 = vmov 0.0   ;;  %v69_v2 = vld [vmem:[#allocation5] sm:$0xff] }
  0x37   :  { %3201 = vmatprep.subr.bf16.mxu1 %v3872_v0  ;;  %3113 = vmatprep.mubr.msk.f32.mxu1 %vm3873_vm0, %v3874_v1  ;;  %v70_v3 = vld [vmem:[#allocation5 + $0x8] sm:$0xff]  ;;  %v210_v4 = vld [vmem:[#allocation7] sm:$0xff]  ;;  %vm80_vm1 = vcmask 261120   ;;  %v71_v7 = vld [vmem:[#allocation5 + $0x10] sm:$0xff]  ;;  %s3876_s30 = smov 32   ;;  %vm512_vm2 = vcmask 1041409  }
  0x38   :  { %v3193_v5 = vpack.c.bf16 %v70_v3, %v69_v2  ;;  %v211_v6 = vld [vmem:[#allocation7 + $0x8] sm:$0xff]  ;;  %v72_v8 = vld [vmem:[#allocation5 + $0x18] sm:$0xff]  ;;  %v212_v11 = vld [vmem:[#allocation7 + $0x10] sm:$0xff]  ;;  %vm515_vm3 = vcmask 1042434   ;;  %vm518_vm4 = vcmask 1043459   ;;  %vm521_vm5 = vcmask 1044484  }
  0x39   :  { %v3964_v9 = vpack.c.bf16 %v211_v6, %v210_v4  ;;  %v3197_v10 = vpack.c.bf16 %v72_v8, %v71_v7  ;;  %v213_v12 = vld [vmem:[#allocation7 + $0x18] sm:$0xff]  ;;  %v61_v13 = vld [vmem:[#allocation2] sm:$0xff]  ;;  %v62_v15 = vld [vmem:[#allocation2 + $0x8] sm:$0xff]  ;;  %vm524_vm6 = vcmask 1045509   ;;  %vm527_vm7 = vcmask 1046534   ;;  %s3877_s6 = smov 96  }
  0x3a   :  { %3194 = vmatprep.subr.bf16.mxu0 %v3193_v5  ;;  %3093 = vmatprep.mubr.msk.f32.mxu0 %vm80_vm1, %v61_v13  ;;  %v3968_v14 = vpack.c.bf16 %v213_v12, %v212_v11  ;;  %v63_v16 = vld [vmem:[#allocation2 + $0x10] sm:$0xff]  ;;  %v64_v17 = vld [vmem:[#allocation2 + $0x18] sm:$0xff]  ;;  %v65_v18 = vld [vmem:[#allocation2 + $0x20] sm:$0xff]  ;;  %vm530_vm8 = vcmask 1047559   ;;  %vm2901_vm9 = vcmask 523264   ;;  %vm2903_vm10 = vcmask 785408  }
  0x3b   :  { %3196 = vmatpush3.bf16.msra.mxu0 %v3193_v5  ;;  %3203 = vmatpush3.bf16.msra.mxu1 %v3964_v9  ;;  %v66_v19 = vld [vmem:[#allocation2 + $0x28] sm:$0xff]  ;;  %v67_v20 = vld [vmem:[#allocation2 + $0x30] sm:$0xff]  ;;  %v68_v21 = vld [vmem:[#allocation2 + $0x38] sm:$0xff]  ;;  %vm2929_vm11 = vcmask 261127   ;;  %s3878_s11 = smov [#allocation8]   ;;  %vm2931_vm12 = vcmask 260096  }
  0x3c   :  { %3198 = vmatprep.subr.bf16.mxu0 %v3197_v10  ;;  %3204 = vmatprep.subr.bf16.mxu1 %v3872_v0  ;;  %v2953_v22 = vld [vmem:[%s4976_s3] ss:$0 sm:$0xff]  ;;  %s3875_s3 = smov 64   ;;  %s2941_s12 = sshll.u32 %s3878_s11, 4  ;;  %s2942_s12 = int_to_ptr.vmem [resolvable:$true] %s2941_s12 }
  0x3d   :  { %s3839_s13 = scalar_lea.vmem %s2942_s12, 128  ;;  %p3844_p11 = scmp.lt.s32.totalorder %s2942_s12, %s2942_s12 }
  0x3e   :  { %p3840_p10 = scmp.ne.s32.totalorder %s2942_s12, %s3839_s13  ;;  %p3845_p12 = scmp.lt.s32.totalorder %s3839_s13, %s3839_s13 }
  0x3f   :  { %3200 = vmatpush3.bf16.msra.mxu0 %v3197_v10  ;;  %3206 = vmatpush3.bf16.msra.mxu1 %v3968_v14 }
  0x40   :  { %3207 = vmatprep.subr.bf16.mxu1 %v3872_v0  ;;  %3213 = vmatprep.subr.bf16.mxu0 %v3872_v0  ;;  %p3846_p13 = por %p3845_p12, %p3844_p11 }
  0x42   :  { %3094 = vmatmul.mubr.msk.f32.vlgmr.msra.gmra.mrb[0].mxu0 %vm80_vm1, %v62_v15  ;;  %3114 = vmatmul.mubr.f32.vlgmr.msra.gmra.mrb[0].mxu1 %v3874_v1  ;;  %p3847_p0 = pnand %p3846_p13, %p3840_p10 }
  0x43   :  { %3096 = vmatprep.mubr.msk.f32.mxu0 %vm80_vm1, %v63_v16  ;;  %3209 = vmatpush3.bf16.msra.mxu1 %v3964_v9 }
  0x44   :  { %3210 = vmatprep.subr.bf16.mxu1 %v3872_v0  ;;  %3124 = vmatprep.mubr.msk.f32.mxu1 %vm3873_vm0, %v3874_v1 }
  0x45   :  { %3215 = vmatpush3.bf16.msra.mxu0 %v3964_v9 }
  0x46   :  { %3097 = vmatmul.mubr.msk.f32.gmra.mrb[2].mxu0 %vm80_vm1, %v64_v17  ;;  %3216 = vmatprep.subr.bf16.mxu0 %v3872_v0 }
  0x47   :  { %3099 = vmatprep.mubr.msk.f32.mxu0 %vm80_vm1, %v65_v18  ;;  %3212 = vmatpush3.bf16.msra.mxu1 %v3968_v14 }
  0x48   :  { %3219 = vmatprep.subr.bf16.mxu1 %v3872_v0 }
  0x49   :  { %3218 = vmatpush3.bf16.msra.mxu0 %v3968_v14 }
  0x4a   :  { %3100 = vmatmul.mubr.msk.f32.gmra.mrb[4].mxu0 %vm80_vm1, %v66_v19  ;;  %3225 = vmatprep.subr.bf16.mxu0 %v3872_v0 }
  0x4b   :  { %3102 = vmatprep.mubr.msk.f32.mxu0 %vm80_vm1, %v67_v20 }
  0x4e   :  { %3103 = vmatmul.mubr.msk.f32.gmra.mrb[6].mxu0 %vm80_vm1, %v68_v21 }
  0x4f   :  { %3135 = vmatprep.mubr.msk.f32.mxu0 %vm3873_vm0, %v3874_v1 }
 0x115   :  { %v3095_v23 = vpop.f32.mrb[0].mxu0  ;;  %v283_v24 = vpop.f32.mrb[0].mxu1 }
 0x116   :  { %v3997_v25 = vadd.f32 %v3095_v23, %v2953_v22  ;;  %v171_v26 = vpop.f32.mrb[1].mxu0  ;;  %v3115_v27 = vpop.f32.mrb[1].mxu1  ;;  %v288_v29 = vrot.slane %v283_v24, 1  ;;  %v290_v32 = vrot.slane %v283_v24, 3  ;;  %v289_v36 = vrot.slane %v283_v24, 2 }
 0x117   :  { %v3999_v28 = vadd.f32 %v2953_v22, %v171_v26  ;;  %v291_v43 = vrot.slane %v283_v24, 4  ;;  %v292_v45 = vrot.slane %v283_v24, 5  ;;  %v293_v50 = vrot.slane %v283_v24, 6 }
 0x118   :  { %v304_v35 = vadd.f32 %v288_v29, %v3997_v25  ;;  %v294_v56 = vrot.slane %v283_v24, 7 }
 0x119   :  { %v3098_v30 = vpop.f32.mrb[2].mxu0  ;;  %v303_v31 = vadd.f32 %v283_v24, %v3999_v28 }
 0x11a   :  { %v4002_v33 = vadd.f32 %v3098_v30, %v2953_v22  ;;  %v181_v34 = vpop.f32.mrb[3].mxu0  ;;  %v2963_v2 = vmul.f32 -1.442695, %v304_v35 }
 0x11b   :  { %v4005_v37 = vadd.f32 %v2953_v22, %v181_v34  ;;  %3261 = vtanh.f32 %v303_v31  ;;  %v2962_v3 = vmul.f32 -1.442695, %v303_v31 }
 0x11c   :  { %3263 = vtanh.f32 %v304_v35  ;;  %v306_v42 = vadd.f32 %v290_v32, %v4002_v33 }
 0x11d   :  { %v3101_v38 = vpop.f32.mrb[4].mxu0  ;;  %v305_v39 = vadd.f32 %v289_v36, %v4005_v37 }
 0x11e   :  { %v4008_v40 = vadd.f32 %v3101_v38, %v2953_v22  ;;  %v191_v41 = vpop.f32.mrb[5].mxu0  ;;  %v2965_v4 = vmul.f32 -1.442695, %v306_v42 }
 0x11f   :  { %v4011_v44 = vadd.f32 %v2953_v22, %v191_v41  ;;  %3265 = vtanh.f32 %v305_v39  ;;  %v2964_v6 = vmul.f32 -1.442695, %v305_v39 }
 0x120   :  { %3267 = vtanh.f32 %v306_v42  ;;  %v308_v49 = vadd.f32 %v292_v45, %v4008_v40 }
 0x121   :  { %v3104_v46 = vpop.f32.mrb[6].mxu0  ;;  %v307_v47 = vadd.f32 %v291_v43, %v4011_v44 }
 0x122   :  { %v201_v48 = vpop.f32.mrb[7].mxu0  ;;  %v4017_v52 = vadd.f32 %v3104_v46, %v2953_v22  ;;  %v2967_v10 = vmul.f32 -1.442695, %v308_v49 }
 0x123   :  { %v4015_v51 = vadd.f32 %v2953_v22, %v201_v48  ;;  %3269 = vtanh.f32 %v307_v47  ;;  %v2966_v5 = vmul.f32 -1.442695, %v307_v47 }
 0x124   :  { %3271 = vtanh.f32 %v308_v49  ;;  %v310_v57 = vadd.f32 %v294_v56, %v4017_v52 }
 0x125   :  { %v3262_v53 = vpop.eup %3261  ;;  %v309_v54 = vadd.f32 %v293_v50, %v4015_v51 }
 0x126   :  { %v3264_v55 = vpop.eup %3263  ;;  %383 = vrot.lane.b32.xlu1 %v3262_v53, %s3875_s3  ;;  %v2969_v13 = vmul.f32 -1.442695, %v310_v57 }
 0x127   :  { %385 = vrot.lane.b32.xlu0 %v3264_v55, %s3875_s3  ;;  %3273 = vtanh.f32 %v309_v54  ;;  %v2968_v7 = vmul.f32 -1.442695, %v309_v54 }
 0x128   :  { %3275 = vtanh.f32 %v310_v57 }
 0x129   :  { %v3266_v58 = vpop.eup %3265  ;;  %3277 = vpow2.f32 %v2963_v2 }
 0x12a   :  { %v3268_v59 = vpop.eup %3267  ;;  %3279 = vpow2.f32 %v2962_v3 }
 0x12b   :  { %387 = vrot.lane.b32.xlu0 %v3266_v58, %s3875_s3  ;;  %389 = vrot.lane.b32.xlu1 %v3268_v59, %s3875_s3  ;;  %3281 = vpow2.f32 %v2965_v4 }
 0x12c   :  { %3283 = vpow2.f32 %v2966_v5 }
 0x12d   :  { %v3270_v60 = vpop.eup %3269  ;;  %3285 = vpow2.f32 %v2964_v6 }
 0x12e   :  { %v3272_v61 = vpop.eup %3271  ;;  %3287 = vpow2.f32 %v2968_v7 }
 0x12f   :  { %391 = vrot.lane.b32.xlu0 %v3270_v60, %s3875_s3  ;;  %393 = vrot.lane.b32.xlu1 %v3272_v61, %s3875_s3  ;;  %3289 = vpow2.f32 %v2967_v10 }
 0x131   :  { %v3274_v62 = vpop.eup %3273 }
 0x132   :  { %v3276_v63 = vpop.eup %3275 }
 0x133   :  { %395 = vrot.lane.b32.xlu0 %v3274_v62, %s3875_s3  ;;  %397 = vrot.lane.b32.xlu1 %v3276_v63, %s3875_s3  ;;  %v3278_v8 = vpop.eup %3277 }
 0x134   :  { %v336_v11 = vadd.f32 1.0, %v3278_v8  ;;  %v3280_v12 = vpop.eup %3279 }
 0x135   :  { %v3282_v15 = vpop.eup %3281  ;;  %v335_v16 = vadd.f32 1.0, %v3280_v12 }
 0x136   :  { %3291 = vrcp.f32 %v336_v11  ;;  %v3284_v17 = vpop.eup %3283  ;;  %v338_v18 = vadd.f32 1.0, %v3282_v15 }
 0x137   :  { %3293 = vpow2.f32 %v2969_v13  ;;  %v3286_v19 = vpop.eup %3285  ;;  %v339_v20 = vadd.f32 1.0, %v3284_v17 }
 0x138   :  { %3295 = vrcp.f32 %v335_v16  ;;  %v3288_v21 = vpop.eup %3287  ;;  %v337_v22 = vadd.f32 1.0, %v3286_v19 }
 0x139   :  { %3297 = vrcp.f32 %v338_v18  ;;  %v3290_v23 = vpop.eup %3289  ;;  %v341_v24 = vadd.f32 1.0, %v3288_v21 }
 0x13a   :  { %3299 = vrcp.f32 %v339_v20  ;;  %v340_v30 = vadd.f32 1.0, %v3290_v23 }
 0x13b   :  { %3301 = vrcp.f32 %v337_v22 }
 0x13c   :  { %3303 = vrcp.f32 %v341_v24 }
 0x13d   :  { %3305 = vrcp.f32 %v340_v30 }
 0x140   :  { %v4029_v26 = vpop.eup %3291 }
 0x141   :  { %v3294_v31 = vpop.eup %3293  ;;  %v368_v60 = vmul.f32 0.0, %v4029_v26 }
 0x142   :  { %v4033_v34 = vpop.eup %3295  ;;  %v342_v36 = vadd.f32 1.0, %v3294_v31 }
 0x143   :  { %v4036_v39 = vpop.eup %3297  ;;  %v367_v63 = vmul.f32 0.0, %v4033_v34 }
 0x144   :  { %v4040_v43 = vpop.eup %3299  ;;  %3307 = vrcp.f32 %v342_v36  ;;  %v370_v4 = vmul.f32 0.0, %v4036_v39 }
 0x145   :  { %v4044_v47 = vpop.eup %3301  ;;  %v371_v7 = vmul.f32 0.0, %v4040_v43 }
 0x146   :  { %v4048_v50 = vpop.eup %3303  ;;  %v369_v10 = vmul.f32 0.0, %v4044_v47 }
 0x147   :  { %v4052_v55 = vpop.eup %3305  ;;  %v373_v15 = vmul.f32 0.0, %v4048_v50 }
 0x148   :  { %v372_v18 = vmul.f32 0.0, %v4052_v55 }
 0x14e   :  { %v4057_v58 = vpop.eup %3307 }
 0x14f   :  { %v374_v23 = vmul.f32 0.0, %v4057_v58 }
 0x198   :  { %v384_v29 = vpop.permute.xlu1 %383 }
 0x199   :  { %v386_v27 = vpop.permute.xlu0 %385  ;;  %v407_v38 = vmul.f32 %v4033_v34, %v384_v29 }
 0x19a   :  { %v408_v32 = vmul.f32 %v4029_v26, %v386_v27 }
 0x19c   :  { %425 = vrot.lane.b32.xlu0 %v408_v32, %s3876_s30 }
 0x19d   :  { %v388_v35 = vpop.permute.xlu0 %387  ;;  %v390_v41 = vpop.permute.xlu1 %389 }
 0x19e   :  { %v410_v42 = vmul.f32 %v4036_v39, %v390_v41  ;;  %v409_v49 = vmul.f32 %v4044_v47, %v388_v35 }
 0x1a0   :  { %423 = vrot.lane.b32.xlu0 %v407_v38, %s3876_s30  ;;  %429 = vrot.lane.b32.xlu1 %v410_v42, %s3876_s30 }
 0x1a1   :  { %v392_v45 = vpop.permute.xlu0 %391  ;;  %v394_v48 = vpop.permute.xlu1 %393 }
 0x1a2   :  { %v411_v46 = vmul.f32 %v4040_v43, %v392_v45  ;;  %v412_v56 = vmul.f32 %v4052_v55, %v394_v48 }
 0x1a4   :  { %431 = vrot.lane.b32.xlu0 %v411_v46, %s3876_s30  ;;  %427 = vrot.lane.b32.xlu1 %v409_v49, %s3876_s30 }
 0x1a5   :  { %v396_v53 = vpop.permute.xlu0 %395  ;;  %v398_v57 = vpop.permute.xlu1 %397 }
 0x1a6   :  { %v413_v54 = vmul.f32 %v4048_v50, %v396_v53  ;;  %v414_v59 = vmul.f32 %v4057_v58, %v398_v57 }
 0x1a8   :  { %435 = vrot.lane.b32.xlu0 %v413_v54, %s3876_s30  ;;  %433 = vrot.lane.b32.xlu1 %v412_v56, %s3876_s30 }
 0x1ac   :  { %437 = vrot.lane.b32.xlu1 %v414_v59, %s3876_s30 }
 0x20e   :  { %v426_v61 = vpop.permute.xlu0 %425 }
 0x20f   :  { %v4062_v62 = vadd.f32 %v426_v61, %v368_v60 }
 0x211   :  { %3309 = vtanh.f32 %v4062_v62 }
 0x212   :  { %v424_v2 = vpop.permute.xlu0 %423  ;;  %v430_v5 = vpop.permute.xlu1 %429 }
 0x213   :  { %v4066_v3 = vadd.f32 %v424_v2, %v367_v63  ;;  %v4070_v6 = vadd.f32 %v430_v5, %v370_v4 }
 0x215   :  { %3311 = vtanh.f32 %v4066_v3 }
 0x216   :  { %v432_v8 = vpop.permute.xlu0 %431  ;;  %3313 = vtanh.f32 %v4070_v6  ;;  %v428_v12 = vpop.permute.xlu1 %427 }
 0x217   :  { %v4075_v11 = vadd.f32 %v432_v8, %v371_v7  ;;  %v4077_v13 = vadd.f32 %v428_v12, %v369_v10 }
 0x219   :  { %3315 = vtanh.f32 %v4075_v11 }
 0x21a   :  { %v436_v16 = vpop.permute.xlu0 %435  ;;  %3317 = vtanh.f32 %v4077_v13  ;;  %v434_v20 = vpop.permute.xlu1 %433 }
 0x21b   :  { %v3310_v17 = vpop.eup %3309  ;;  %v4083_v19 = vadd.f32 %v436_v16, %v373_v15  ;;  %v4086_v21 = vadd.f32 %v434_v20, %v372_v18 }
 0x21c   :  { %473 = vrot.lane.b32.xlu0 %v3310_v17, %s3875_s3 }
 0x21d   :  { %3319 = vtanh.f32 %v4083_v19 }
 0x21e   :  { %3321 = vtanh.f32 %v4086_v21  ;;  %v438_v24 = vpop.permute.xlu1 %437 }
 0x21f   :  { %v3312_v22 = vpop.eup %3311  ;;  %v4092_v29 = vadd.f32 %v438_v24, %v374_v23 }
 0x220   :  { %471 = vrot.lane.b32.xlu0 %v3312_v22, %s3875_s3  ;;  %v3314_v27 = vpop.eup %3313 }
 0x221   :  { %477 = vrot.lane.b32.xlu1 %v3314_v27, %s3875_s3  ;;  %3323 = vtanh.f32 %v4092_v29 }
 0x223   :  { %v3316_v30 = vpop.eup %3315 }
 0x224   :  { %479 = vrot.lane.b32.xlu0 %v3316_v30, %s3875_s3  ;;  %v3318_v31 = vpop.eup %3317 }
 0x225   :  { %475 = vrot.lane.b32.xlu1 %v3318_v31, %s3875_s3 }
 0x227   :  { %v3320_v32 = vpop.eup %3319 }
 0x228   :  { %483 = vrot.lane.b32.xlu0 %v3320_v32, %s3875_s3  ;;  %v3322_v35 = vpop.eup %3321 }
 0x229   :  { %481 = vrot.lane.b32.xlu1 %v3322_v35, %s3875_s3 }
 0x22b   :  { %v3324_v36 = vpop.eup %3323 }
 0x22d   :  { %485 = vrot.lane.b32.xlu1 %v3324_v36, %s3875_s3 }
 0x28e   :  { %v474_v38 = vpop.permute.xlu0 %473 }
 0x28f   :  { %v496_v45 = vmul.f32 %v4029_v26, %v474_v38 }
 0x291   :  { %v511_v57 = vrot.slane %v496_v45, 7 }
 0x292   :  { %v472_v41 = vpop.permute.xlu0 %471 }
 0x293   :  { %v478_v42 = vpop.permute.xlu1 %477  ;;  %v495_v48 = vmul.f32 %v4033_v34, %v472_v41 }
 0x294   :  { %v498_v49 = vmul.f32 %v4036_v39, %v478_v42 }
 0x295   :  { %v513_v61 = vsel %vm512_vm2, %v511_v57, %v495_v48 }
 0x296   :  { %v480_v46 = vpop.permute.xlu0 %479  ;;  %v517_v63 = vrot.slane %v498_v49, 5 }
 0x297   :  { %v476_v53 = vpop.permute.xlu1 %475  ;;  %v499_v56 = vmul.f32 %v4040_v43, %v480_v46 }
 0x298   :  { %v497_v54 = vmul.f32 %v4044_v47, %v476_v53 }
 0x299   :  { %v520_v2 = vrot.slane %v499_v56, 4 }
 0x29a   :  { %v484_v59 = vpop.permute.xlu0 %483  ;;  %v514_v60 = vrot.slane %v497_v54, 6 }
 0x29b   :  { %v482_v26 = vpop.permute.xlu1 %481  ;;  %v501_v34 = vmul.f32 %v4048_v50, %v484_v59 }
 0x29c   :  { %v516_v39 = vsel %vm515_vm3, %v514_v60, %v513_v61  ;;  %v500_v4 = vmul.f32 %v4052_v55, %v482_v26 }
 0x29d   :  { %v519_v47 = vsel %vm518_vm4, %v517_v63, %v516_v39  ;;  %v526_v7 = vrot.slane %v501_v34, 2 }
 0x29e   :  { %v522_v43 = vsel %vm521_vm5, %v520_v2, %v519_v47  ;;  %v523_v5 = vrot.slane %v500_v4, 3 }
 0x29f   :  { %v486_v8 = vpop.permute.xlu1 %485 }
 0x2a0   :  { %v502_v10 = vmul.f32 %v4057_v58, %v486_v8  ;;  %v525_v12 = vsel %vm524_vm6, %v523_v5, %v522_v43 }
 0x2a1   :  { %v528_v15 = vsel %vm527_vm7, %v526_v7, %v525_v12 }
 0x2a2   :  { %v529_v50 = vrot.slane %v502_v10, 1 }
 0x2a4   :  { %v531_v16 = vsel %vm530_vm8, %v529_v50, %v528_v15 }
 0x2a5   :  { %532 = vrot.lane.b32.xlu0 %v531_v16, %s3876_s30 }
 0x317   :  { %v4117_v55 = vpop.permute.xlu0 %532 }
 0x318   :  { %3125 = vmatmul.mubr.msk.f32.vlgmr.msra.gmra.mrb[2].mxu1 %vm80_vm1, %v4117_v55 }
 0x319   :  { %3221 = vmatpush3.bf16.msra.mxu1 %v3964_v9  ;;  %3146 = vmatprep.mubr.msk.f32.mxu1 %vm3873_vm0, %v3874_v1 }
 0x31a   :  { %3222 = vmatprep.subr.bf16.mxu1 %v3872_v0 }
 0x31d   :  { %3224 = vmatpush3.bf16.msra.mxu1 %v3968_v14 }
 0x31e   :  { %3231 = vmatprep.subr.bf16.mxu1 %v3872_v0 }
 0x3eb   :  { %v602_v58 = vpop.f32.mrb[2].mxu1 }
 0x3ec   :  { %v3126_v17 = vpop.f32.mrb[3].mxu1  ;;  %v608_v18 = vrot.slane %v602_v58, 1  ;;  %v607_v20 = vrot.slane %v602_v58, 7  ;;  %v623_v22 = vadd.f32 %v602_v58, %v3997_v25  ;;  %v609_v23 = vrot.slane %v602_v58, 2 }
 0x3ed   :  { %v610_v27 = vrot.slane %v602_v58, 3  ;;  %v611_v31 = vrot.slane %v602_v58, 4  ;;  %v612_v35 = vrot.slane %v602_v58, 5  ;;  %v613_v38 = vrot.slane %v602_v58, 6 }
 0x3ee   :  { %v624_v24 = vadd.f32 %v608_v18, %v4005_v37  ;;  %v622_v30 = vadd.f32 %v607_v20, %v3999_v28  ;;  %3325 = vtanh.f32 %v623_v22  ;;  %v625_v32 = vadd.f32 %v609_v23, %v4002_v33 }
 0x3ef   :  { %v626_v36 = vadd.f32 %v610_v27, %v4011_v44  ;;  %v627_v41 = vadd.f32 %v611_v31, %v4008_v40  ;;  %v628_v42 = vadd.f32 %v612_v35, %v4015_v51  ;;  %v629_v45 = vadd.f32 %v613_v38, %v4017_v52 }
 0x3f0   :  { %3327 = vtanh.f32 %v624_v24  ;;  %v2972_v60 = vmul.f32 -1.442695, %v623_v22  ;;  %v2973_v61 = vmul.f32 -1.442695, %v624_v24  ;;  %v2971_v63 = vmul.f32 -1.442695, %v622_v30 }
 0x3f1   :  { %3329 = vtanh.f32 %v622_v30  ;;  %v2974_v26 = vmul.f32 -1.442695, %v625_v32  ;;  %v2975_v34 = vmul.f32 -1.442695, %v626_v36  ;;  %v2976_v39 = vmul.f32 -1.442695, %v627_v41 }
 0x3f2   :  { %3331 = vtanh.f32 %v625_v32  ;;  %v2977_v2 = vmul.f32 -1.442695, %v628_v42  ;;  %v2978_v4 = vmul.f32 -1.442695, %v629_v45 }
 0x3f3   :  { %3333 = vtanh.f32 %v626_v36 }
 0x3f4   :  { %3335 = vtanh.f32 %v627_v41 }
 0x3f5   :  { %3337 = vtanh.f32 %v628_v42 }
 0x3f6   :  { %3339 = vtanh.f32 %v629_v45 }
 0x3f7   :  { %3341 = vpow2.f32 %v2972_v60 }
 0x3f8   :  { %v3326_v46 = vpop.eup %3325  ;;  %3343 = vpow2.f32 %v2973_v61 }
 0x3f9   :  { %728 = vrot.lane.b32.xlu1 %v3326_v46, %s3875_s3  ;;  %3345 = vpow2.f32 %v2971_v63 }
 0x3fa   :  { %v3328_v48 = vpop.eup %3327  ;;  %3347 = vpow2.f32 %v2974_v26 }
 0x3fb   :  { %730 = vrot.lane.b32.xlu0 %v3328_v48, %s3875_s3  ;;  %v3330_v49 = vpop.eup %3329  ;;  %3349 = vpow2.f32 %v2975_v34 }
 0x3fc   :  { %v3332_v53 = vpop.eup %3331  ;;  %3351 = vpow2.f32 %v2976_v39  ;;  %v695_v39 = vrot.slane %v4062_v62, 7 }
 0x3fd   :  { %726 = vrot.lane.b32.xlu1 %v3330_v49, %s3875_s3  ;;  %v3334_v54 = vpop.eup %3333  ;;  %3353 = vpow2.f32 %v2977_v2  ;;  %v696_v2 = vrot.slane %v4077_v13, 7 }
 0x3fe   :  { %v3336_v56 = vpop.eup %3335  ;;  %3355 = vpow2.f32 %v2978_v4 }
 0x3ff   :  { %732 = vrot.lane.b32.xlu0 %v3332_v53, %s3875_s3  ;;  %v3338_v57 = vpop.eup %3337 }
 0x400   :  { %v3340_v59 = vpop.eup %3339 }
 0x401   :  { %734 = vrot.lane.b32.xlu1 %v3334_v54, %s3875_s3  ;;  %v3342_v47 = vpop.eup %3341 }
 0x402   :  { %v3344_v43 = vpop.eup %3343  ;;  %v655_v5 = vadd.f32 1.0, %v3342_v47 }
 0x403   :  { %736 = vrot.lane.b32.xlu0 %v3336_v56, %s3875_s3  ;;  %v3346_v7 = vpop.eup %3345  ;;  %v656_v8 = vadd.f32 1.0, %v3344_v43 }
 0x404   :  { %v3348_v10 = vpop.eup %3347  ;;  %3357 = vrcp.f32 %v655_v5  ;;  %v654_v12 = vadd.f32 1.0, %v3346_v7  ;;  %v694_v5 = vrot.slane %v4066_v3, 7 }
 0x405   :  { %738 = vrot.lane.b32.xlu1 %v3338_v57, %s3875_s3  ;;  %v3350_v50 = vpop.eup %3349  ;;  %3359 = vrcp.f32 %v656_v8  ;;  %v657_v15 = vadd.f32 1.0, %v3348_v10  ;;  %v697_v10 = vrot.slane %v4070_v6, 7 }
 0x406   :  { %v3352_v16 = vpop.eup %3351  ;;  %3361 = vrcp.f32 %v654_v12  ;;  %v658_v58 = vadd.f32 1.0, %v3350_v50 }
 0x407   :  { %740 = vrot.lane.b32.xlu0 %v3340_v59, %s3875_s3  ;;  %v3354_v17 = vpop.eup %3353  ;;  %3363 = vrcp.f32 %v657_v15  ;;  %v659_v18 = vadd.f32 1.0, %v3352_v16  ;;  %v698_v15 = vrot.slane %v4075_v11, 7 }
 0x408   :  { %v3356_v20 = vpop.eup %3355  ;;  %3365 = vrcp.f32 %v658_v58  ;;  %v660_v22 = vadd.f32 1.0, %v3354_v17  ;;  %v699_v58 = vrot.slane %v4086_v21, 7 }
 0x409   :  { %3367 = vrcp.f32 %v659_v18  ;;  %v661_v23 = vadd.f32 1.0, %v3356_v20 }
 0x40a   :  { %3369 = vrcp.f32 %v660_v22  ;;  %v700_v22 = vrot.slane %v4083_v19, 7 }
 0x40b   :  { %3371 = vrcp.f32 %v661_v23 }
 0x40e   :  { %v4143_v24 = vpop.eup %3357 }
 0x40f   :  { %v4145_v30 = vpop.eup %3359  ;;  %v711_v4 = vmul.f32 %v4143_v24, %v695_v39 }
 0x410   :  { %v4150_v36 = vpop.eup %3361  ;;  %v712_v43 = vmul.f32 %v4145_v30, %v696_v2 }
 0x411   :  { %v4153_v41 = vpop.eup %3363  ;;  %v710_v62 = vmul.f32 %v4150_v36, %v694_v5 }
 0x412   :  { %v4158_v48 = vpop.eup %3365  ;;  %v713_v50 = vmul.f32 %v4153_v41, %v697_v10 }
 0x413   :  { %v4161_v53 = vpop.eup %3367  ;;  %v714_v6 = vmul.f32 %v4158_v48, %v698_v15 }
 0x414   :  { %v4166_v59 = vpop.eup %3369  ;;  %v715_v20 = vmul.f32 %v4161_v53, %v699_v58 }
 0x415   :  { %v4169_v61 = vpop.eup %3371  ;;  %v716_v21 = vmul.f32 %v4166_v59, %v700_v22 }
 0x46b   :  { %v729_v27 = vpop.permute.xlu1 %728 }
 0x46c   :  { %v751_v31 = vmul.f32 %v4143_v24, %v729_v27  ;;  %v701_v27 = vrot.slane %v4092_v29, 7 }
 0x46d   :  { %v731_v32 = vpop.permute.xlu0 %730 }
 0x46e   :  { %v752_v35 = vmul.f32 %v4145_v30, %v731_v32  ;;  %768 = vrot.lane.b32.xlu1 %v751_v31, %s3876_s30 }
 0x46f   :  { %v727_v38 = vpop.permute.xlu1 %726 }
 0x470   :  { %770 = vrot.lane.b32.xlu0 %v752_v35, %s3876_s30  ;;  %v750_v42 = vmul.f32 %v4150_v36, %v727_v38  ;;  %v717_v35 = vmul.f32 %v4169_v61, %v701_v27 }
 0x471   :  { %v733_v45 = vpop.permute.xlu0 %732 }
 0x472   :  { %v753_v46 = vmul.f32 %v4153_v41, %v733_v45  ;;  %766 = vrot.lane.b32.xlu1 %v750_v42, %s3876_s30 }
 0x473   :  { %v735_v49 = vpop.permute.xlu1 %734 }
 0x474   :  { %772 = vrot.lane.b32.xlu0 %v753_v46, %s3876_s30  ;;  %v754_v54 = vmul.f32 %v4158_v48, %v735_v49 }
 0x475   :  { %v737_v56 = vpop.permute.xlu0 %736 }
 0x476   :  { %v755_v57 = vmul.f32 %v4161_v53, %v737_v56  ;;  %774 = vrot.lane.b32.xlu1 %v754_v54, %s3876_s30 }
 0x477   :  { %v739_v60 = vpop.permute.xlu1 %738 }
 0x478   :  { %776 = vrot.lane.b32.xlu0 %v755_v57, %s3876_s30  ;;  %v756_v63 = vmul.f32 %v4166_v59, %v739_v60 }
 0x479   :  { %v741_v26 = vpop.permute.xlu0 %740 }
 0x47a   :  { %v757_v34 = vmul.f32 %v4169_v61, %v741_v26  ;;  %778 = vrot.lane.b32.xlu1 %v756_v63, %s3876_s30 }
 0x47c   :  { %780 = vrot.lane.b32.xlu0 %v757_v34, %s3876_s30 }
 0x4e0   :  { %v769_v47 = vpop.permute.xlu1 %768 }
 0x4e1   :  { %v4180_v7 = vadd.f32 %v769_v47, %v711_v4 }
 0x4e2   :  { %v771_v8 = vpop.permute.xlu0 %770 }
 0x4e3   :  { %v4183_v12 = vadd.f32 %v771_v8, %v712_v43  ;;  %3373 = vtanh.f32 %v4180_v7 }
 0x4e4   :  { %v767_v13 = vpop.permute.xlu1 %766 }
 0x4e5   :  { %3375 = vtanh.f32 %v4183_v12  ;;  %v4190_v16 = vadd.f32 %v767_v13, %v710_v62 }
 0x4e6   :  { %v773_v3 = vpop.permute.xlu0 %772 }
 0x4e7   :  { %v4193_v17 = vadd.f32 %v773_v3, %v713_v50  ;;  %3377 = vtanh.f32 %v4190_v16 }
 0x4e8   :  { %v775_v18 = vpop.permute.xlu1 %774 }
 0x4e9   :  { %3379 = vtanh.f32 %v4193_v17  ;;  %v4200_v23 = vadd.f32 %v775_v18, %v714_v6 }
 0x4ea   :  { %v777_v11 = vpop.permute.xlu0 %776 }
 0x4eb   :  { %v4203_v31 = vadd.f32 %v777_v11, %v715_v20  ;;  %3381 = vtanh.f32 %v4200_v23 }
 0x4ec   :  { %v779_v32 = vpop.permute.xlu1 %778 }
 0x4ed   :  { %3383 = vtanh.f32 %v4203_v31  ;;  %v3374_v38 = vpop.eup %3373  ;;  %v4209_v42 = vadd.f32 %v779_v32, %v716_v21 }
 0x4ee   :  { %v781_v19 = vpop.permute.xlu0 %780  ;;  %816 = vrot.lane.b32.xlu1 %v3374_v38, %s3875_s3 }
 0x4ef   :  { %v3376_v45 = vpop.eup %3375  ;;  %v4211_v46 = vadd.f32 %v781_v19, %v717_v35  ;;  %3385 = vtanh.f32 %v4209_v42 }
 0x4f0   :  { %818 = vrot.lane.b32.xlu0 %v3376_v45, %s3875_s3 }
 0x4f1   :  { %3387 = vtanh.f32 %v4211_v46  ;;  %v3378_v29 = vpop.eup %3377 }
 0x4f2   :  { %814 = vrot.lane.b32.xlu1 %v3378_v29, %s3875_s3 }
 0x4f3   :  { %v3380_v49 = vpop.eup %3379 }
 0x4f4   :  { %820 = vrot.lane.b32.xlu0 %v3380_v49, %s3875_s3 }
 0x4f5   :  { %v3382_v54 = vpop.eup %3381 }
 0x4f6   :  { %822 = vrot.lane.b32.xlu1 %v3382_v54, %s3875_s3 }
 0x4f7   :  { %v3384_v56 = vpop.eup %3383 }
 0x4f8   :  { %824 = vrot.lane.b32.xlu0 %v3384_v56, %s3875_s3 }
 0x4f9   :  { %v3386_v57 = vpop.eup %3385 }
 0x4fa   :  { %826 = vrot.lane.b32.xlu1 %v3386_v57, %s3875_s3 }
 0x4fb   :  { %v3388_v60 = vpop.eup %3387 }
 0x4fc   :  { %828 = vrot.lane.b32.xlu0 %v3388_v60, %s3875_s3 }
 0x560   :  { %v817_v63 = vpop.permute.xlu1 %816 }
 0x561   :  { %v839_v43 = vmul.f32 %v4143_v24, %v817_v63 }
 0x562   :  { %v819_v26 = vpop.permute.xlu0 %818 }
 0x563   :  { %v840_v34 = vmul.f32 %v4145_v30, %v819_v26 }
 0x564   :  { %v815_v39 = vpop.permute.xlu1 %814 }
 0x565   :  { %v838_v2 = vmul.f32 %v4150_v36, %v815_v39  ;;  %v856_v8 = vrot.slane %v840_v34, 7 }
 0x566   :  { %v821_v4 = vpop.permute.xlu0 %820 }
 0x567   :  { %v841_v47 = vmul.f32 %v4153_v41, %v821_v4  ;;  %v854_v5 = vrot.slane %v838_v2, 1 }
 0x568   :  { %v823_v62 = vpop.permute.xlu1 %822 }
 0x569   :  { %v858_v10 = vrot.slane %v841_v47, 6  ;;  %v855_v13 = vsel %vm512_vm2, %v839_v43, %v854_v5  ;;  %v842_v50 = vmul.f32 %v4158_v48, %v823_v62 }
 0x56a   :  { %v825_v15 = vpop.permute.xlu0 %824  ;;  %v857_v3 = vsel %vm515_vm3, %v856_v8, %v855_v13 }
 0x56b   :  { %v843_v30 = vmul.f32 %v4161_v53, %v825_v15  ;;  %v859_v36 = vsel %vm518_vm4, %v858_v10, %v857_v3  ;;  %v860_v58 = vrot.slane %v842_v50, 5 }
 0x56c   :  { %v827_v41 = vpop.permute.xlu1 %826 }
 0x56d   :  { %v862_v6 = vrot.slane %v843_v30, 4  ;;  %v861_v24 = vsel %vm521_vm5, %v860_v58, %v859_v36  ;;  %v844_v18 = vmul.f32 %v4166_v59, %v827_v41 }
 0x56e   :  { %v829_v20 = vpop.permute.xlu0 %828 }
 0x56f   :  { %v845_v22 = vmul.f32 %v4169_v61, %v829_v20  ;;  %v863_v11 = vsel %vm524_vm6, %v862_v6, %v861_v24  ;;  %v864_v48 = vrot.slane %v844_v18, 3 }
 0x571   :  { %v866_v27 = vrot.slane %v845_v22, 2  ;;  %v865_v21 = vsel %vm527_vm7, %v864_v48, %v863_v11 }
 0x573   :  { %v4238_v53 = vsel %vm530_vm8, %v866_v27, %v865_v21 }
 0x574   :  { %868 = vrot.lane.b32.xlu1 %v4238_v53, %s3876_s30 }
 0x5e6   :  { %v869_v32 = vpop.permute.xlu1 %868 }
 0x5e7   :  { %3136 = vmatmul.mubr.msk.f32.vlgmr.msra.gmra.mrb[8].mxu0 %vm80_vm1, %v869_v32 }
 0x5e8   :  { %3227 = vmatpush3.bf16.msra.mxu0 %v3964_v9  ;;  %3157 = vmatprep.mubr.msk.f32.mxu0 %vm3873_vm0, %v3874_v1 }
 0x5e9   :  { %3228 = vmatprep.subr.bf16.mxu0 %v3872_v0 }
 0x5ec   :  { %3230 = vmatpush3.bf16.msra.mxu0 %v3968_v14 }
 0x5ed   :  { %3237 = vmatprep.subr.bf16.mxu0 %v3872_v0 }
 0x6ba   :  { %v938_v59 = vpop.f32.mrb[8].mxu0 }
 0x6bb   :  { %v943_v61 = vrot.slane %v938_v59, 6  ;;  %v3137_v35 = vpop.f32.mrb[9].mxu0  ;;  %v945_v19 = vrot.slane %v938_v59, 1  ;;  %v944_v45 = vrot.slane %v938_v59, 7  ;;  %v960_v29 = vadd.f32 %v938_v59, %v4005_v37 }
 0x6bc   :  { %v946_v49 = vrot.slane %v938_v59, 2  ;;  %v947_v57 = vrot.slane %v938_v59, 3  ;;  %v948_v63 = vrot.slane %v938_v59, 4  ;;  %v949_v34 = vrot.slane %v938_v59, 5 }
 0x6bd   :  { %v958_v38 = vadd.f32 %v943_v61, %v3999_v28  ;;  %v961_v54 = vadd.f32 %v945_v19, %v4002_v33  ;;  %v959_v60 = vadd.f32 %v944_v45, %v3997_v25  ;;  %v2982_v15 = vmul.f32 -1.442695, %v960_v29 }
 0x6be   :  { %v962_v26 = vadd.f32 %v946_v49, %v4011_v44  ;;  %v963_v39 = vadd.f32 %v947_v57, %v4008_v40  ;;  %v964_v2 = vadd.f32 %v948_v63, %v4015_v51  ;;  %v965_v4 = vadd.f32 %v949_v34, %v4017_v52 }
 0x6bf   :  { %3389 = vtanh.f32 %v958_v38  ;;  %v2980_v50 = vmul.f32 -1.442695, %v958_v38  ;;  %v2983_v3 = vmul.f32 -1.442695, %v961_v54  ;;  %v2981_v36 = vmul.f32 -1.442695, %v959_v60 }
 0x6c0   :  { %3391 = vtanh.f32 %v960_v29  ;;  %v2984_v58 = vmul.f32 -1.442695, %v962_v26  ;;  %v2985_v41 = vmul.f32 -1.442695, %v963_v39  ;;  %v2986_v24 = vmul.f32 -1.442695, %v964_v2 }
 0x6c1   :  { %3393 = vtanh.f32 %v961_v54  ;;  %v2987_v18 = vmul.f32 -1.442695, %v965_v4 }
 0x6c2   :  { %3395 = vtanh.f32 %v959_v60 }
 0x6c3   :  { %3397 = vtanh.f32 %v962_v26 }
 0x6c4   :  { %3399 = vtanh.f32 %v963_v39 }
 0x6c5   :  { %3401 = vtanh.f32 %v964_v2 }
 0x6c6   :  { %3403 = vtanh.f32 %v965_v4 }
 0x6c7   :  { %3405 = vpow2.f32 %v2980_v50 }
 0x6c8   :  { %3407 = vpow2.f32 %v2982_v15 }
 0x6c9   :  { %v3390_v56 = vpop.eup %3389  ;;  %3409 = vpow2.f32 %v2983_v3 }
 0x6ca   :  { %1062 = vrot.lane.b32.xlu0 %v3390_v56, %s3875_s3  ;;  %v3392_v47 = vpop.eup %3391  ;;  %3411 = vpow2.f32 %v2981_v36 }
 0x6cb   :  { %v3394_v43 = vpop.eup %3393  ;;  %1066 = vrot.lane.b32.xlu1 %v3392_v47, %s3875_s3  ;;  %3413 = vpow2.f32 %v2984_v58 }
 0x6cc   :  { %v3396_v5 = vpop.eup %3395 }
 0x6cd   :  { %v3398_v8 = vpop.eup %3397 }
 0x6ce   :  { %1068 = vrot.lane.b32.xlu0 %v3394_v43, %s3875_s3  ;;  %v3400_v10 = vpop.eup %3399 }
 0x6cf   :  { %1064 = vrot.lane.b32.xlu1 %v3396_v5, %s3875_s3  ;;  %v3402_v62 = vpop.eup %3401 }
 0x6d0   :  { %v3404_v13 = vpop.eup %3403 }
 0x6d1   :  { %v3406_v30 = vpop.eup %3405 }
 0x6d2   :  { %1070 = vrot.lane.b32.xlu0 %v3398_v8, %s3875_s3  ;;  %v990_v6 = vadd.f32 1.0, %v3406_v30  ;;  %v3408_v20 = vpop.eup %3407 }
 0x6d3   :  { %1072 = vrot.lane.b32.xlu1 %v3400_v10, %s3875_s3  ;;  %v3410_v22 = vpop.eup %3409  ;;  %v992_v11 = vadd.f32 1.0, %v3408_v20  ;;  %v1032_v20 = vrot.slane %v4183_v12, 7 }
 0x6d4   :  { %3415 = vrcp.f32 %v990_v6  ;;  %v3412_v48 = vpop.eup %3411  ;;  %v993_v27 = vadd.f32 1.0, %v3410_v22  ;;  %v1030_v6 = vrot.slane %v4190_v16, 7  ;;  %v1033_v22 = vrot.slane %v4193_v17, 7 }
 0x6d5   :  { %3417 = vpow2.f32 %v2985_v41  ;;  %v3414_v21 = vpop.eup %3413  ;;  %v991_v61 = vadd.f32 1.0, %v3412_v48 }
 0x6d6   :  { %1074 = vrot.lane.b32.xlu0 %v3402_v62, %s3875_s3  ;;  %3419 = vpow2.f32 %v2986_v24  ;;  %v994_v19 = vadd.f32 1.0, %v3414_v21  ;;  %v1031_v21 = vrot.slane %v4180_v7, 7  ;;  %v1035_v7 = vrot.slane %v4203_v31, 7 }
 0x6d7   :  { %1076 = vrot.lane.b32.xlu1 %v3404_v13, %s3875_s3  ;;  %3421 = vpow2.f32 %v2987_v18 }
 0x6d8   :  { %3423 = vrcp.f32 %v992_v11 }
 0x6d9   :  { %3425 = vrcp.f32 %v993_v27 }
 0x6da   :  { %3427 = vrcp.f32 %v991_v61  ;;  %v1034_v61 = vrot.slane %v4200_v23, 7  ;;  %v1036_v23 = vrot.slane %v4209_v42, 7 }
 0x6db   :  { %3429 = vrcp.f32 %v994_v19 }
 0x6de   :  { %v4265_v32 = vpop.eup %3415 }
 0x6df   :  { %v3418_v35 = vpop.eup %3417  ;;  %v1046_v41 = vmul.f32 %v4265_v32, %v1030_v6 }
 0x6e0   :  { %v3420_v45 = vpop.eup %3419  ;;  %v995_v29 = vadd.f32 1.0, %v3418_v35 }
 0x6e1   :  { %v3422_v49 = vpop.eup %3421  ;;  %v996_v54 = vadd.f32 1.0, %v3420_v45 }
 0x6e2   :  { %3431 = vrcp.f32 %v995_v29  ;;  %v997_v56 = vadd.f32 1.0, %v3422_v49  ;;  %v4269_v57 = vpop.eup %3423 }
 0x6e3   :  { %3433 = vrcp.f32 %v996_v54  ;;  %v4271_v63 = vpop.eup %3425  ;;  %v1048_v11 = vmul.f32 %v4269_v57, %v1032_v20 }
 0x6e4   :  { %3435 = vrcp.f32 %v997_v56  ;;  %v4276_v2 = vpop.eup %3427  ;;  %v1049_v27 = vmul.f32 %v4271_v63, %v1033_v22 }
 0x6e5   :  { %v4279_v47 = vpop.eup %3429  ;;  %v1047_v12 = vmul.f32 %v4276_v2, %v1031_v21 }
 0x6e6   :  { %v1050_v19 = vmul.f32 %v4279_v47, %v1034_v61 }
 0x6ec   :  { %v4284_v10 = vpop.eup %3431 }
 0x6ed   :  { %v4287_v13 = vpop.eup %3433  ;;  %v1051_v54 = vmul.f32 %v4284_v10, %v1035_v7 }
 0x6ee   :  { %v4292_v30 = vpop.eup %3435 }
 0x73c   :  { %v1063_v59 = vpop.permute.xlu0 %1062 }
 0x73d   :  { %v1086_v38 = vmul.f32 %v4265_v32, %v1063_v59  ;;  %v1067_v60 = vpop.permute.xlu1 %1066 }
 0x73e   :  { %v1088_v26 = vmul.f32 %v4269_v57, %v1067_v60  ;;  %v1052_v60 = vmul.f32 %v4287_v13, %v1036_v23 }
 0x73f   :  { %1102 = vrot.lane.b32.xlu0 %v1086_v38, %s3876_s30 }
 0x740   :  { %v1069_v34 = vpop.permute.xlu0 %1068  ;;  %1106 = vrot.lane.b32.xlu1 %v1088_v26, %s3876_s30  ;;  %v1037_v26 = vrot.slane %v4211_v46, 7 }
 0x741   :  { %v1089_v39 = vmul.f32 %v4271_v63, %v1069_v34  ;;  %v1065_v4 = vpop.permute.xlu1 %1064 }
 0x742   :  { %v1087_v43 = vmul.f32 %v4276_v2, %v1065_v4  ;;  %v1053_v42 = vmul.f32 %v4292_v30, %v1037_v26 }
 0x743   :  { %1108 = vrot.lane.b32.xlu0 %v1089_v39, %s3876_s30 }
 0x744   :  { %v1071_v5 = vpop.permute.xlu0 %1070  ;;  %1104 = vrot.lane.b32.xlu1 %v1087_v43, %s3876_s30 }
 0x745   :  { %v1090_v8 = vmul.f32 %v4279_v47, %v1071_v5  ;;  %v1073_v62 = vpop.permute.xlu1 %1072 }
 0x746   :  { %v1091_v50 = vmul.f32 %v4284_v10, %v1073_v62 }
 0x747   :  { %1110 = vrot.lane.b32.xlu0 %v1090_v8, %s3876_s30 }
 0x748   :  { %v1075_v15 = vpop.permute.xlu0 %1074  ;;  %1112 = vrot.lane.b32.xlu1 %v1091_v50, %s3876_s30 }
 0x749   :  { %v1092_v3 = vmul.f32 %v4287_v13, %v1075_v15  ;;  %v1077_v36 = vpop.permute.xlu1 %1076 }
 0x74a   :  { %v1093_v58 = vmul.f32 %v4292_v30, %v1077_v36 }
 0x74b   :  { %1114 = vrot.lane.b32.xlu0 %v1092_v3, %s3876_s30 }
 0x74c   :  { %1116 = vrot.lane.b32.xlu1 %v1093_v58, %s3876_s30 }
 0x7b1   :  { %v1103_v24 = vpop.permute.xlu0 %1102 }
 0x7b2   :  { %v4299_v18 = vadd.f32 %v1103_v24, %v1046_v41  ;;  %v1107_v48 = vpop.permute.xlu1 %1106 }
 0x7b3   :  { %v4307_v59 = vadd.f32 %v1107_v48, %v1048_v11 }
 0x7b4   :  { %3437 = vtanh.f32 %v4299_v18 }
 0x7b5   :  { %v1109_v16 = vpop.permute.xlu0 %1108  ;;  %3439 = vtanh.f32 %v4307_v59 }
 0x7b6   :  { %v4310_v35 = vadd.f32 %v1109_v16, %v1049_v27  ;;  %v1105_v17 = vpop.permute.xlu1 %1104 }
 0x7b7   :  { %v4318_v45 = vadd.f32 %v1105_v17, %v1047_v12 }
 0x7b8   :  { %3441 = vtanh.f32 %v4310_v35 }
 0x7b9   :  { %v1111_v29 = vpop.permute.xlu0 %1110  ;;  %3443 = vtanh.f32 %v4318_v45 }
 0x7ba   :  { %v4321_v49 = vadd.f32 %v1111_v29, %v1050_v19  ;;  %v1113_v56 = vpop.permute.xlu1 %1112 }
 0x7bb   :  { %v4328_v34 = vadd.f32 %v1113_v56, %v1051_v54 }
 0x7bc   :  { %3445 = vtanh.f32 %v4321_v49 }
 0x7bd   :  { %v1115_v31 = vpop.permute.xlu0 %1114  ;;  %3447 = vtanh.f32 %v4328_v34 }
 0x7be   :  { %v3438_v38 = vpop.eup %3437  ;;  %v4330_v39 = vadd.f32 %v1115_v31, %v1052_v60  ;;  %v1117_v4 = vpop.permute.xlu1 %1116 }
 0x7bf   :  { %1150 = vrot.lane.b32.xlu0 %v3438_v38, %s3875_s3  ;;  %v3440_v43 = vpop.eup %3439  ;;  %v4335_v5 = vadd.f32 %v1117_v4, %v1053_v42 }
 0x7c0   :  { %3449 = vtanh.f32 %v4330_v39  ;;  %1154 = vrot.lane.b32.xlu1 %v3440_v43, %s3875_s3 }
 0x7c1   :  { %3451 = vtanh.f32 %v4335_v5 }
 0x7c2   :  { %v3442_v8 = vpop.eup %3441 }
 0x7c3   :  { %1156 = vrot.lane.b32.xlu0 %v3442_v8, %s3875_s3  ;;  %v3444_v46 = vpop.eup %3443 }
 0x7c4   :  { %1152 = vrot.lane.b32.xlu1 %v3444_v46, %s3875_s3 }
 0x7c6   :  { %v3446_v62 = vpop.eup %3445 }
 0x7c7   :  { %1158 = vrot.lane.b32.xlu0 %v3446_v62, %s3875_s3  ;;  %v3448_v50 = vpop.eup %3447 }
 0x7c8   :  { %1160 = vrot.lane.b32.xlu1 %v3448_v50, %s3875_s3 }
 0x7ca   :  { %v3450_v15 = vpop.eup %3449 }
 0x7cb   :  { %1162 = vrot.lane.b32.xlu0 %v3450_v15, %s3875_s3  ;;  %v3452_v3 = vpop.eup %3451 }
 0x7cc   :  { %1164 = vrot.lane.b32.xlu1 %v3452_v3, %s3875_s3 }
 0x831   :  { %v1151_v36 = vpop.permute.xlu0 %1150 }
 0x832   :  { %v1155_v58 = vpop.permute.xlu1 %1154  ;;  %v1174_v41 = vmul.f32 %v4265_v32, %v1151_v36 }
 0x833   :  { %v1176_v61 = vmul.f32 %v4269_v57, %v1155_v58 }
 0x834   :  { %v1190_v27 = vrot.slane %v1174_v41, 2 }
 0x835   :  { %v1157_v6 = vpop.permute.xlu0 %1156 }
 0x836   :  { %v1177_v24 = vmul.f32 %v4271_v63, %v1157_v6  ;;  %v1153_v20 = vpop.permute.xlu1 %1152 }
 0x837   :  { %v1175_v22 = vmul.f32 %v4276_v2, %v1153_v20 }
 0x838   :  { %v1194_v16 = vrot.slane %v1177_v24, 7 }
 0x839   :  { %v1159_v11 = vpop.permute.xlu0 %1158  ;;  %v1191_v21 = vrot.slane %v1175_v22, 1 }
 0x83a   :  { %v1178_v48 = vmul.f32 %v4279_v47, %v1159_v11  ;;  %v1161_v38 = vpop.permute.xlu1 %1160 }
 0x83b   :  { %v1192_v17 = vsel %vm512_vm2, %v1191_v21, %v1190_v27  ;;  %v1179_v19 = vmul.f32 %v4284_v10, %v1161_v38 }
 0x83c   :  { %v1196_v12 = vrot.slane %v1178_v48, 6  ;;  %v1193_v63 = vsel %vm515_vm3, %v1176_v61, %v1192_v17 }
 0x83d   :  { %v1163_v32 = vpop.permute.xlu0 %1162  ;;  %v1195_v2 = vsel %vm518_vm4, %v1194_v16, %v1193_v63  ;;  %v1198_v29 = vrot.slane %v1179_v19, 5 }
 0x83e   :  { %v1180_v7 = vmul.f32 %v4287_v13, %v1163_v32  ;;  %v1197_v47 = vsel %vm521_vm5, %v1196_v12, %v1195_v2  ;;  %v1165_v23 = vpop.permute.xlu1 %1164 }
 0x83f   :  { %v1181_v57 = vmul.f32 %v4292_v30, %v1165_v23  ;;  %v1199_v56 = vsel %vm524_vm6, %v1198_v29, %v1197_v47 }
 0x840   :  { %v1200_v54 = vrot.slane %v1180_v7, 4 }
 0x841   :  { %v1202_v26 = vrot.slane %v1181_v57, 3 }
 0x842   :  { %v1201_v60 = vsel %vm527_vm7, %v1200_v54, %v1199_v56 }
 0x843   :  { %v4360_v10 = vsel %vm530_vm8, %v1202_v26, %v1201_v60 }
 0x844   :  { %1204 = vrot.lane.b32.xlu0 %v4360_v10, %s3876_s30 }
 0x8b6   :  { %v1205_v13 = vpop.permute.xlu0 %1204 }
 0x8b7   :  { %3147 = vmatmul.mubr.msk.f32.vlgmr.msra.gmra.mrb[4].mxu1 %vm80_vm1, %v1205_v13 }
 0x8b8   :  { %3233 = vmatpush3.bf16.msra.mxu1 %v3964_v9  ;;  %3168 = vmatprep.mubr.msk.f32.mxu1 %vm3873_vm0, %v3874_v1 }
 0x8b9   :  { %3234 = vmatprep.subr.bf16.mxu1 %v3872_v0 }
 0x8bc   :  { %3236 = vmatpush3.bf16.msra.mxu1 %v3968_v14 }
 0x8bd   :  { %3243 = vmatprep.subr.bf16.mxu1 %v3872_v0 }
 0x98a   :  { %v1274_v30 = vpop.f32.mrb[4].mxu1 }
 0x98b   :  { %v3148_v31 = vpop.f32.mrb[5].mxu1  ;;  %v1280_v42 = vrot.slane %v1274_v30, 6  ;;  %v1282_v4 = vrot.slane %v1274_v30, 1  ;;  %v1279_v8 = vrot.slane %v1274_v30, 5  ;;  %v1297_v46 = vadd.f32 %v1274_v30, %v4002_v33 }
 0x98c   :  { %v1283_v62 = vrot.slane %v1274_v30, 2  ;;  %v1281_v15 = vrot.slane %v1274_v30, 7  ;;  %v1285_v36 = vrot.slane %v1274_v30, 4  ;;  %v1284_v6 = vrot.slane %v1274_v30, 3 }
 0x98d   :  { %v1295_v43 = vadd.f32 %v1280_v42, %v3997_v25  ;;  %v1298_v50 = vadd.f32 %v1282_v4, %v4011_v44  ;;  %v1294_v3 = vadd.f32 %v1279_v8, %v3999_v28  ;;  %v2992_v17 = vmul.f32 -1.442695, %v1297_v46 }
 0x98e   :  { %v1299_v58 = vadd.f32 %v1283_v62, %v4008_v40  ;;  %v1296_v41 = vadd.f32 %v1281_v15, %v4005_v37  ;;  %v1301_v24 = vadd.f32 %v1285_v36, %v4017_v52  ;;  %v1300_v22 = vadd.f32 %v1284_v6, %v4015_v51 }
 0x98f   :  { %3453 = vtanh.f32 %v1295_v43  ;;  %v2990_v12 = vmul.f32 -1.442695, %v1295_v43  ;;  %v2993_v19 = vmul.f32 -1.442695, %v1298_v50  ;;  %v2989_v32 = vmul.f32 -1.442695, %v1294_v3 }
 0x990   :  { %3455 = vtanh.f32 %v1297_v46  ;;  %v2994_v63 = vmul.f32 -1.442695, %v1299_v58  ;;  %v2991_v7 = vmul.f32 -1.442695, %v1296_v41  ;;  %v2996_v2 = vmul.f32 -1.442695, %v1301_v24 }
 0x991   :  { %3457 = vtanh.f32 %v1298_v50  ;;  %v2995_v47 = vmul.f32 -1.442695, %v1300_v22 }
 0x992   :  { %3459 = vtanh.f32 %v1294_v3 }
 0x993   :  { %3461 = vtanh.f32 %v1299_v58 }
 0x994   :  { %3463 = vtanh.f32 %v1296_v41 }
 0x995   :  { %3465 = vtanh.f32 %v1301_v24 }
 0x996   :  { %3467 = vtanh.f32 %v1300_v22 }
 0x997   :  { %3469 = vpow2.f32 %v2990_v12 }
 0x998   :  { %3471 = vpow2.f32 %v2992_v17 }
 0x999   :  { %v3454_v20 = vpop.eup %3453  ;;  %3473 = vpow2.f32 %v2993_v19 }
 0x99a   :  { %1400 = vrot.lane.b32.xlu0 %v3454_v20, %s3875_s3  ;;  %v3456_v11 = vpop.eup %3455  ;;  %3475 = vpow2.f32 %v2989_v32 }
 0x99b   :  { %1404 = vrot.lane.b32.xlu1 %v3456_v11, %s3875_s3  ;;  %v3458_v48 = vpop.eup %3457  ;;  %3477 = vpow2.f32 %v2994_v63 }
 0x99c   :  { %v3460_v27 = vpop.eup %3459  ;;  %3479 = vpow2.f32 %v2991_v7 }
 0x99d   :  { %v3462_v21 = vpop.eup %3461  ;;  %3481 = vpow2.f32 %v2996_v2 }
 0x99e   :  { %1406 = vrot.lane.b32.xlu0 %v3458_v48, %s3875_s3  ;;  %v3464_v16 = vpop.eup %3463  ;;  %3483 = vpow2.f32 %v2995_v47  ;;  %v1369_v47 = vrot.slane %v4310_v35, 7  ;;  %v1371_v35 = vrot.slane %v4328_v34, 7 }
 0x99f   :  { %1398 = vrot.lane.b32.xlu1 %v3460_v27, %s3875_s3  ;;  %v3466_v61 = vpop.eup %3465 }
 0x9a0   :  { %v3468_v38 = vpop.eup %3467 }
 0x9a1   :  { %v3470_v29 = vpop.eup %3469 }
 0x9a2   :  { %1408 = vrot.lane.b32.xlu0 %v3462_v21, %s3875_s3  ;;  %v3472_v23 = vpop.eup %3471  ;;  %v1327_v54 = vadd.f32 1.0, %v3470_v29  ;;  %v1367_v29 = vrot.slane %v4318_v45, 7 }
 0x9a3   :  { %1402 = vrot.lane.b32.xlu1 %v3464_v16, %s3875_s3  ;;  %v3474_v57 = vpop.eup %3473  ;;  %v1329_v56 = vadd.f32 1.0, %v3472_v23 }
 0x9a4   :  { %v3476_v60 = vpop.eup %3475  ;;  %3485 = vrcp.f32 %v1327_v54  ;;  %v1330_v26 = vadd.f32 1.0, %v3474_v57  ;;  %v1370_v57 = vrot.slane %v4321_v49, 7 }
 0x9a5   :  { %v3478_v13 = vpop.eup %3477  ;;  %3487 = vrcp.f32 %v1329_v56  ;;  %v1326_v30 = vadd.f32 1.0, %v3476_v60 }
 0x9a6   :  { %1412 = vrot.lane.b32.xlu0 %v3466_v61, %s3875_s3  ;;  %v3480_v31 = vpop.eup %3479  ;;  %3489 = vrcp.f32 %v1330_v26  ;;  %v1331_v42 = vadd.f32 1.0, %v3478_v13  ;;  %v1366_v13 = vrot.slane %v4299_v18, 7 }
 0x9a7   :  { %1410 = vrot.lane.b32.xlu1 %v3468_v38, %s3875_s3  ;;  %v3482_v4 = vpop.eup %3481  ;;  %3491 = vrcp.f32 %v1326_v30  ;;  %v1328_v43 = vadd.f32 1.0, %v3480_v31 }
 0x9a8   :  { %v3484_v8 = vpop.eup %3483  ;;  %3493 = vrcp.f32 %v1331_v42  ;;  %v1333_v46 = vadd.f32 1.0, %v3482_v4 }
 0x9a9   :  { %3495 = vrcp.f32 %v1328_v43  ;;  %v1332_v15 = vadd.f32 1.0, %v3484_v8  ;;  %v1368_v43 = vrot.slane %v4307_v59, 7 }
 0x9aa   :  { %3497 = vrcp.f32 %v1333_v46 }
 0x9ab   :  { %3499 = vrcp.f32 %v1332_v15 }
 0x9ae   :  { %v4387_v62 = vpop.eup %3485 }
 0x9af   :  { %v4390_v36 = vpop.eup %3487  ;;  %v1383_v23 = vmul.f32 %v4387_v62, %v1367_v29 }
 0x9b0   :  { %v4394_v41 = vpop.eup %3489  ;;  %v1385_v56 = vmul.f32 %v4390_v36, %v1369_v47 }
 0x9b1   :  { %v4398_v22 = vpop.eup %3491  ;;  %v1386_v45 = vmul.f32 %v4394_v41, %v1370_v57 }
 0x9b2   :  { %v4402_v27 = vpop.eup %3493  ;;  %v1382_v49 = vmul.f32 %v4398_v22, %v1366_v13 }
 0x9b3   :  { %v4406_v61 = vpop.eup %3495  ;;  %v1387_v18 = vmul.f32 %v4402_v27, %v1371_v35 }
 0x9b4   :  { %v4410_v17 = vpop.eup %3497  ;;  %v1384_v34 = vmul.f32 %v4406_v61, %v1368_v43 }
 0x9b5   :  { %v4414_v63 = vpop.eup %3499 }
 0xa0c   :  { %v1401_v50 = vpop.permute.xlu0 %1400 }
 0xa0d   :  { %v1423_v3 = vmul.f32 %v4387_v62, %v1401_v50  ;;  %v1405_v58 = vpop.permute.xlu1 %1404  ;;  %v1373_v50 = vrot.slane %v4335_v5, 7 }
 0xa0e   :  { %v1425_v6 = vmul.f32 %v4390_v36, %v1405_v58  ;;  %v1372_v58 = vrot.slane %v4330_v39, 7 }
 0xa0f   :  { %1440 = vrot.lane.b32.xlu0 %v1423_v3, %s3876_s30  ;;  %v1389_v59 = vmul.f32 %v4410_v17, %v1373_v50 }
 0xa10   :  { %v1407_v24 = vpop.permute.xlu0 %1406  ;;  %1444 = vrot.lane.b32.xlu1 %v1425_v6, %s3876_s30  ;;  %v1388_v5 = vmul.f32 %v4414_v63, %v1372_v58 }
 0xa11   :  { %v1426_v20 = vmul.f32 %v4394_v41, %v1407_v24  ;;  %v1399_v11 = vpop.permute.xlu1 %1398 }
 0xa12   :  { %v1422_v48 = vmul.f32 %v4398_v22, %v1399_v11 }
 0xa13   :  { %1446 = vrot.lane.b32.xlu0 %v1426_v20, %s3876_s30 }
 0xa14   :  { %v1409_v21 = vpop.permute.xlu0 %1408  ;;  %1438 = vrot.lane.b32.xlu1 %v1422_v48, %s3876_s30 }
 0xa15   :  { %v1427_v16 = vmul.f32 %v4402_v27, %v1409_v21  ;;  %v1403_v38 = vpop.permute.xlu1 %1402 }
 0xa16   :  { %v1424_v12 = vmul.f32 %v4406_v61, %v1403_v38 }
 0xa17   :  { %1448 = vrot.lane.b32.xlu0 %v1427_v16, %s3876_s30 }
 0xa18   :  { %v1413_v19 = vpop.permute.xlu0 %1412  ;;  %1442 = vrot.lane.b32.xlu1 %v1424_v12, %s3876_s30 }
 0xa19   :  { %v1429_v32 = vmul.f32 %v4410_v17, %v1413_v19  ;;  %v1411_v7 = vpop.permute.xlu1 %1410 }
 0xa1a   :  { %v1428_v2 = vmul.f32 %v4414_v63, %v1411_v7 }
 0xa1b   :  { %1452 = vrot.lane.b32.xlu0 %v1429_v32, %s3876_s30 }
 0xa1c   :  { %1450 = vrot.lane.b32.xlu1 %v1428_v2, %s3876_s30 }
 0xa81   :  { %v1441_v54 = vpop.permute.xlu0 %1440 }
 0xa82   :  { %v4424_v60 = vadd.f32 %v1441_v54, %v1383_v23  ;;  %v1445_v26 = vpop.permute.xlu1 %1444 }
 0xa83   :  { %v4427_v30 = vadd.f32 %v1445_v26, %v1385_v56 }
 0xa84   :  { %3501 = vtanh.f32 %v4424_v60 }
 0xa85   :  { %v1447_v31 = vpop.permute.xlu0 %1446  ;;  %3503 = vtanh.f32 %v4427_v30 }
 0xa86   :  { %v4434_v42 = vadd.f32 %v1447_v31, %v1386_v45  ;;  %v1439_v4 = vpop.permute.xlu1 %1438 }
 0xa87   :  { %v4437_v8 = vadd.f32 %v1439_v4, %v1382_v49 }
 0xa88   :  { %3505 = vtanh.f32 %v4434_v42 }
 0xa89   :  { %v1449_v46 = vpop.permute.xlu0 %1448  ;;  %3507 = vtanh.f32 %v4437_v8 }
 0xa8a   :  { %v4444_v15 = vadd.f32 %v1449_v46, %v1387_v18  ;;  %v1443_v3 = vpop.permute.xlu1 %1442 }
 0xa8b   :  { %v4447_v6 = vadd.f32 %v1443_v3, %v1384_v34 }
 0xa8c   :  { %3509 = vtanh.f32 %v4444_v15 }
 0xa8d   :  { %v1453_v24 = vpop.permute.xlu0 %1452  ;;  %3511 = vtanh.f32 %v4447_v6 }
 0xa8e   :  { %v3502_v20 = vpop.eup %3501  ;;  %v4453_v11 = vadd.f32 %v1453_v24, %v1389_v59  ;;  %v1451_v48 = vpop.permute.xlu1 %1450 }
 0xa8f   :  { %1488 = vrot.lane.b32.xlu0 %v3502_v20, %s3875_s3  ;;  %v3504_v21 = vpop.eup %3503  ;;  %v4456_v16 = vadd.f32 %v1451_v48, %v1388_v5 }
 0xa90   :  { %3513 = vtanh.f32 %v4453_v11  ;;  %1492 = vrot.lane.b32.xlu1 %v3504_v21, %s3875_s3 }
 0xa91   :  { %3515 = vtanh.f32 %v4456_v16 }
 0xa92   :  { %v3506_v39 = vpop.eup %3505 }
 0xa93   :  { %1494 = vrot.lane.b32.xlu0 %v3506_v39, %s3875_s3  ;;  %v3508_v38 = vpop.eup %3507 }
 0xa94   :  { %1486 = vrot.lane.b32.xlu1 %v3508_v38, %s3875_s3 }
 0xa96   :  { %v3510_v12 = vpop.eup %3509 }
 0xa97   :  { %1496 = vrot.lane.b32.xlu0 %v3510_v12, %s3875_s3  ;;  %v3512_v19 = vpop.eup %3511 }
 0xa98   :  { %1490 = vrot.lane.b32.xlu1 %v3512_v19, %s3875_s3 }
 0xa9a   :  { %v3514_v32 = vpop.eup %3513 }
 0xa9b   :  { %1500 = vrot.lane.b32.xlu0 %v3514_v32, %s3875_s3  ;;  %v3516_v7 = vpop.eup %3515 }
 0xa9c   :  { %1498 = vrot.lane.b32.xlu1 %v3516_v7, %s3875_s3 }
 0xb01   :  { %v1489_v2 = vpop.permute.xlu0 %1488 }
 0xb02   :  { %v1493_v29 = vpop.permute.xlu1 %1492  ;;  %v1511_v57 = vmul.f32 %v4387_v62, %v1489_v2 }
 0xb03   :  { %v1513_v46 = vmul.f32 %v4390_v36, %v1493_v29 }
 0xb04   :  { %v1527_v49 = vrot.slane %v1511_v57, 2 }
 0xb05   :  { %v1495_v47 = vpop.permute.xlu0 %1494 }
 0xb06   :  { %v1487_v23 = vpop.permute.xlu1 %1486  ;;  %v1514_v31 = vmul.f32 %v4394_v41, %v1495_v47 }
 0xb07   :  { %v1510_v54 = vmul.f32 %v4398_v22, %v1487_v23 }
 0xb08   :  { %v1532_v34 = vrot.slane %v1514_v31, 7 }
 0xb09   :  { %v1497_v56 = vpop.permute.xlu0 %1496  ;;  %v1526_v26 = vrot.slane %v1510_v54, 3 }
 0xb0a   :  { %v1491_v13 = vpop.permute.xlu1 %1490  ;;  %v1515_v45 = vmul.f32 %v4402_v27, %v1497_v56 }
 0xb0b   :  { %v1512_v35 = vmul.f32 %v4406_v61, %v1491_v13  ;;  %v1528_v22 = vsel %vm512_vm2, %v1527_v49, %v1526_v26 }
 0xb0c   :  { %v1534_v50 = vrot.slane %v1515_v45, 6 }
 0xb0d   :  { %v1501_v4 = vpop.permute.xlu0 %1500  ;;  %v1529_v43 = vrot.slane %v1512_v35, 1 }
 0xb0e   :  { %v1517_v18 = vmul.f32 %v4410_v17, %v1501_v4  ;;  %v1499_v62 = vpop.permute.xlu1 %1498 }
 0xb0f   :  { %v1530_v3 = vsel %vm515_vm3, %v1529_v43, %v1528_v22  ;;  %v1516_v27 = vmul.f32 %v4414_v63, %v1499_v62 }
 0xb10   :  { %v1531_v41 = vsel %vm518_vm4, %v1513_v46, %v1530_v3  ;;  %v1538_v58 = vrot.slane %v1517_v18, 4 }
 0xb11   :  { %v1533_v61 = vsel %vm521_vm5, %v1532_v34, %v1531_v41  ;;  %v1536_v59 = vrot.slane %v1516_v27, 5 }
 0xb12   :  { %v1535_v24 = vsel %vm524_vm6, %v1534_v50, %v1533_v61 }
 0xb13   :  { %v1537_v17 = vsel %vm527_vm7, %v1536_v59, %v1535_v24 }
 0xb14   :  { %v4482_v36 = vsel %vm530_vm8, %v1538_v58, %v1537_v17 }
 0xb15   :  { %1540 = vrot.lane.b32.xlu1 %v4482_v36, %s3876_s30 }
 0xb87   :  { %v1541_v20 = vpop.permute.xlu1 %1540 }
 0xb88   :  { %3158 = vmatmul.mubr.msk.f32.vlgmr.msra.gmra.mrb[10].mxu0 %vm80_vm1, %v1541_v20 }
 0xb89   :  { %3239 = vmatpush3.bf16.msra.mxu0 %v3964_v9  ;;  %3179 = vmatprep.mubr.msk.f32.mxu0 %vm3873_vm0, %v3874_v1 }
 0xb8a   :  { %3240 = vmatprep.subr.bf16.mxu0 %v3872_v0 }
 0xb8d   :  { %3242 = vmatpush3.bf16.msra.mxu0 %v3968_v14 }
 0xc5b   :  { %v1610_v63 = vpop.f32.mrb[10].mxu0 }
 0xc5c   :  { %v1615_v5 = vrot.slane %v1610_v63, 4  ;;  %v3159_v48 = vpop.f32.mrb[11].mxu0  ;;  %v1617_v39 = vrot.slane %v1610_v63, 6  ;;  %v1619_v38 = vrot.slane %v1610_v63, 1  ;;  %v1616_v19 = vrot.slane %v1610_v63, 5 }
 0xc5d   :  { %v1634_v32 = vadd.f32 %v1610_v63, %v4011_v44  ;;  %v1620_v2 = vrot.slane %v1610_v63, 2  ;;  %v1618_v47 = vrot.slane %v1610_v63, 7  ;;  %v1621_v57 = vrot.slane %v1610_v63, 3 }
 0xc5e   :  { %v1630_v21 = vadd.f32 %v1615_v5, %v3999_v28  ;;  %v1632_v12 = vadd.f32 %v1617_v39, %v4005_v37  ;;  %v1635_v29 = vadd.f32 %v1619_v38, %v4008_v40  ;;  %v1631_v23 = vadd.f32 %v1616_v19, %v3997_v25 }
 0xc5f   :  { %v1636_v54 = vadd.f32 %v1620_v2, %v4015_v51  ;;  %v1633_v56 = vadd.f32 %v1618_v47, %v4002_v33  ;;  %v1637_v13 = vadd.f32 %v1621_v57, %v4017_v52  ;;  %v3002_v22 = vmul.f32 -1.442695, %v1634_v32 }
 0xc60   :  { %3517 = vtanh.f32 %v1630_v21  ;;  %v2998_v18 = vmul.f32 -1.442695, %v1630_v21  ;;  %v3000_v46 = vmul.f32 -1.442695, %v1632_v12  ;;  %v3003_v62 = vmul.f32 -1.442695, %v1635_v29 }
 0xc61   :  { %3519 = vtanh.f32 %v1632_v12  ;;  %v2999_v34 = vmul.f32 -1.442695, %v1631_v23  ;;  %v3004_v27 = vmul.f32 -1.442695, %v1636_v54  ;;  %v3001_v41 = vmul.f32 -1.442695, %v1633_v56 }
 0xc62   :  { %3521 = vtanh.f32 %v1634_v32  ;;  %v3005_v61 = vmul.f32 -1.442695, %v1637_v13 }
 0xc63   :  { %3523 = vtanh.f32 %v1635_v29 }
 0xc64   :  { %3525 = vtanh.f32 %v1631_v23 }
 0xc65   :  { %3527 = vtanh.f32 %v1636_v54 }
 0xc66   :  { %3529 = vtanh.f32 %v1633_v56 }
 0xc67   :  { %3531 = vtanh.f32 %v1637_v13 }
 0xc68   :  { %3533 = vpow2.f32 %v2998_v18 }
 0xc69   :  { %3535 = vpow2.f32 %v3000_v46 }
 0xc6a   :  { %v3518_v7 = vpop.eup %3517  ;;  %3537 = vpow2.f32 %v3002_v22 }
 0xc6b   :  { %1734 = vrot.lane.b32.xlu0 %v3518_v7, %s3875_s3  ;;  %v3520_v26 = vpop.eup %3519  ;;  %3539 = vpow2.f32 %v3003_v62 }
 0xc6c   :  { %v3522_v45 = vpop.eup %3521  ;;  %3541 = vpow2.f32 %v2999_v34 }
 0xc6d   :  { %1742 = vrot.lane.b32.xlu1 %v3522_v45, %s3875_s3  ;;  %v3524_v31 = vpop.eup %3523 }
 0xc6e   :  { %v3526_v35 = vpop.eup %3525 }
 0xc6f   :  { %1738 = vrot.lane.b32.xlu0 %v3520_v26, %s3875_s3  ;;  %v3528_v49 = vpop.eup %3527 }
 0xc70   :  { %v3530_v4 = vpop.eup %3529 }
 0xc71   :  { %1736 = vrot.lane.b32.xlu1 %v3526_v35, %s3875_s3  ;;  %v3532_v43 = vpop.eup %3531 }
 0xc72   :  { %v3534_v50 = vpop.eup %3533 }
 0xc73   :  { %1744 = vrot.lane.b32.xlu0 %v3524_v31, %s3875_s3  ;;  %v1662_v3 = vadd.f32 1.0, %v3534_v50  ;;  %v3536_v58 = vpop.eup %3535 }
 0xc74   :  { %v3538_v59 = vpop.eup %3537  ;;  %v1664_v24 = vadd.f32 1.0, %v3536_v58 }
 0xc75   :  { %1740 = vrot.lane.b32.xlu1 %v3530_v4, %s3875_s3  ;;  %3543 = vrcp.f32 %v1662_v3  ;;  %v3540_v17 = vpop.eup %3539  ;;  %v1666_v20 = vadd.f32 1.0, %v3538_v59 }
 0xc76   :  { %3545 = vpow2.f32 %v3004_v27  ;;  %v3542_v63 = vpop.eup %3541  ;;  %v1667_v21 = vadd.f32 1.0, %v3540_v17  ;;  %v1706_v17 = vrot.slane %v4434_v42, 7 }
 0xc77   :  { %1746 = vrot.lane.b32.xlu0 %v3528_v49, %s3875_s3  ;;  %3547 = vpow2.f32 %v3001_v41  ;;  %v1663_v12 = vadd.f32 1.0, %v3542_v63  ;;  %v1702_v41 = vrot.slane %v4437_v8, 7 }
 0xc78   :  { %3549 = vpow2.f32 %v3005_v61 }
 0xc79   :  { %1748 = vrot.lane.b32.xlu1 %v3532_v43, %s3875_s3  ;;  %3551 = vrcp.f32 %v1664_v24  ;;  %v1704_v24 = vrot.slane %v4447_v6, 7 }
 0xc7a   :  { %3553 = vrcp.f32 %v1666_v20 }
 0xc7b   :  { %3555 = vrcp.f32 %v1667_v21 }
 0xc7c   :  { %3557 = vrcp.f32 %v1663_v12  ;;  %v1703_v12 = vrot.slane %v4424_v60, 7  ;;  %v1705_v60 = vrot.slane %v4427_v30, 7 }
 0xc7f   :  { %v4508_v5 = vpop.eup %3543 }
 0xc80   :  { %v3546_v39 = vpop.eup %3545  ;;  %v1718_v58 = vmul.f32 %v4508_v5, %v1702_v41 }
 0xc81   :  { %v3548_v19 = vpop.eup %3547  ;;  %v1668_v32 = vadd.f32 1.0, %v3546_v39 }
 0xc82   :  { %v1665_v7 = vadd.f32 1.0, %v3548_v19  ;;  %v3550_v2 = vpop.eup %3549 }
 0xc83   :  { %3559 = vrcp.f32 %v1668_v32  ;;  %v4512_v29 = vpop.eup %3551  ;;  %v1669_v23 = vadd.f32 1.0, %v3550_v2  ;;  %v1708_v32 = vrot.slane %v4456_v16, 7 }
 0xc84   :  { %3561 = vrcp.f32 %v1665_v7  ;;  %v4515_v57 = vpop.eup %3553  ;;  %v1720_v20 = vmul.f32 %v4512_v29, %v1704_v24 }
 0xc85   :  { %v4519_v13 = vpop.eup %3555  ;;  %3563 = vrcp.f32 %v1669_v23  ;;  %v1722_v21 = vmul.f32 %v4515_v57, %v1706_v17 }
 0xc86   :  { %v4523_v35 = vpop.eup %3557 }
 0xc8d   :  { %v4527_v43 = vpop.eup %3559 }
 0xc8e   :  { %v4531_v22 = vpop.eup %3561  ;;  %v1724_v23 = vmul.f32 %v4527_v43, %v1708_v32 }
 0xc8f   :  { %v4536_v34 = vpop.eup %3563  ;;  %v1721_v16 = vmul.f32 %v4531_v22, %v1705_v60 }
 0xcdd   :  { %v1735_v48 = vpop.permute.xlu0 %1734 }
 0xcde   :  { %v1758_v38 = vmul.f32 %v4508_v5, %v1735_v48  ;;  %v1707_v48 = vrot.slane %v4444_v15, 7  ;;  %v1719_v15 = vmul.f32 %v4523_v35, %v1703_v12 }
 0xcdf   :  { %v1743_v56 = vpop.permute.xlu1 %1742 }
 0xce0   :  { %1774 = vrot.lane.b32.xlu0 %v1758_v38, %s3876_s30  ;;  %v1762_v26 = vmul.f32 %v4515_v57, %v1743_v56  ;;  %v1723_v6 = vmul.f32 %v4519_v13, %v1707_v48 }
 0xce1   :  { %v1739_v47 = vpop.permute.xlu0 %1738 }
 0xce2   :  { %v1760_v54 = vmul.f32 %v4512_v29, %v1739_v47  ;;  %1782 = vrot.lane.b32.xlu1 %v1762_v26, %s3876_s30 }
 0xce3   :  { %v1737_v49 = vpop.permute.xlu1 %1736 }
 0xce4   :  { %1778 = vrot.lane.b32.xlu0 %v1760_v54, %s3876_s30  ;;  %v1759_v4 = vmul.f32 %v4523_v35, %v1737_v49 }
 0xce5   :  { %v1745_v45 = vpop.permute.xlu0 %1744 }
 0xce6   :  { %v1763_v31 = vmul.f32 %v4519_v13, %v1745_v45  ;;  %1776 = vrot.lane.b32.xlu1 %v1759_v4, %s3876_s30  ;;  %v1709_v45 = vrot.slane %v4453_v11, 7 }
 0xce7   :  { %v1741_v50 = vpop.permute.xlu1 %1740 }
 0xce8   :  { %1784 = vrot.lane.b32.xlu0 %v1763_v31, %s3876_s30  ;;  %v1761_v62 = vmul.f32 %v4531_v22, %v1741_v50  ;;  %v1725_v49 = vmul.f32 %v4536_v34, %v1709_v45 }
 0xce9   :  { %v1747_v18 = vpop.permute.xlu0 %1746 }
 0xcea   :  { %v1764_v46 = vmul.f32 %v4527_v43, %v1747_v18  ;;  %1780 = vrot.lane.b32.xlu1 %v1761_v62, %s3876_s30 }
 0xceb   :  { %v1749_v3 = vpop.permute.xlu1 %1748 }
 0xcec   :  { %1786 = vrot.lane.b32.xlu0 %v1764_v46, %s3876_s30  ;;  %v1765_v27 = vmul.f32 %v4536_v34, %v1749_v3 }
 0xcee   :  { %1788 = vrot.lane.b32.xlu1 %v1765_v27, %s3876_s30 }
 0xd52   :  { %v1775_v61 = vpop.permute.xlu0 %1774 }
 0xd53   :  { %v4542_v59 = vadd.f32 %v1775_v61, %v1718_v58 }
 0xd54   :  { %v1783_v8 = vpop.permute.xlu1 %1782 }
 0xd55   :  { %3565 = vtanh.f32 %v4542_v59  ;;  %v4553_v19 = vadd.f32 %v1783_v8, %v1722_v21 }
 0xd56   :  { %v1779_v63 = vpop.permute.xlu0 %1778 }
 0xd57   :  { %v4550_v39 = vadd.f32 %v1779_v63, %v1720_v20 }
 0xd58   :  { %v1777_v2 = vpop.permute.xlu1 %1776 }
 0xd59   :  { %3567 = vtanh.f32 %v4550_v39  ;;  %v4564_v47 = vadd.f32 %v1777_v2, %v1719_v15 }
 0xd5a   :  { %v1785_v42 = vpop.permute.xlu0 %1784  ;;  %3569 = vtanh.f32 %v4553_v19 }
 0xd5b   :  { %v4561_v7 = vadd.f32 %v1785_v42, %v1723_v6 }
 0xd5c   :  { %v1781_v26 = vpop.permute.xlu1 %1780 }
 0xd5d   :  { %3571 = vtanh.f32 %v4561_v7  ;;  %v4573_v31 = vadd.f32 %v1781_v26, %v1721_v16 }
 0xd5e   :  { %v1787_v54 = vpop.permute.xlu0 %1786  ;;  %3573 = vtanh.f32 %v4564_v47 }
 0xd5f   :  { %v3566_v38 = vpop.eup %3565  ;;  %v4570_v56 = vadd.f32 %v1787_v54, %v1724_v23 }
 0xd60   :  { %1822 = vrot.lane.b32.xlu0 %v3566_v38, %s3875_s3  ;;  %v1789_v4 = vpop.permute.xlu1 %1788 }
 0xd61   :  { %3575 = vtanh.f32 %v4570_v56  ;;  %v4579_v46 = vadd.f32 %v1789_v4, %v1725_v49 }
 0xd62   :  { %3577 = vtanh.f32 %v4573_v31 }
 0xd63   :  { %v3568_v30 = vpop.eup %3567  ;;  %3579 = vtanh.f32 %v4579_v46 }
 0xd64   :  { %1826 = vrot.lane.b32.xlu0 %v3568_v30, %s3875_s3  ;;  %v3570_v18 = vpop.eup %3569 }
 0xd65   :  { %1830 = vrot.lane.b32.xlu1 %v3570_v18, %s3875_s3 }
 0xd67   :  { %v3572_v50 = vpop.eup %3571 }
 0xd68   :  { %1832 = vrot.lane.b32.xlu0 %v3572_v50, %s3875_s3  ;;  %v3574_v11 = vpop.eup %3573 }
 0xd69   :  { %1824 = vrot.lane.b32.xlu1 %v3574_v11, %s3875_s3 }
 0xd6b   :  { %v3576_v62 = vpop.eup %3575 }
 0xd6c   :  { %1834 = vrot.lane.b32.xlu0 %v3576_v62, %s3875_s3  ;;  %v3578_v3 = vpop.eup %3577 }
 0xd6d   :  { %1828 = vrot.lane.b32.xlu1 %v3578_v3, %s3875_s3  ;;  %v3580_v27 = vpop.eup %3579 }
 0xd71   :  { %1836 = vrot.lane.b32.xlu1 %v3580_v27, %s3875_s3 }
 0xdd2   :  { %v1823_v41 = vpop.permute.xlu0 %1822 }
 0xdd3   :  { %v1846_v20 = vmul.f32 %v4508_v5, %v1823_v41 }
 0xdd5   :  { %v1862_v38 = vrot.slane %v1846_v20, 4 }
 0xdd6   :  { %v1827_v58 = vpop.permute.xlu0 %1826 }
 0xdd7   :  { %v1831_v61 = vpop.permute.xlu1 %1830  ;;  %v1848_v24 = vmul.f32 %v4512_v29, %v1827_v58 }
 0xdd8   :  { %v1850_v23 = vmul.f32 %v4515_v57, %v1831_v61 }
 0xdd9   :  { %v1865_v21 = vrot.slane %v1848_v24, 2 }
 0xdda   :  { %v1833_v17 = vpop.permute.xlu0 %1832 }
 0xddb   :  { %v1825_v63 = vpop.permute.xlu1 %1824  ;;  %v1851_v6 = vmul.f32 %v4519_v13, %v1833_v17 }
 0xddc   :  { %v1847_v48 = vmul.f32 %v4523_v35, %v1825_v63 }
 0xddd   :  { %v1870_v5 = vrot.slane %v1851_v6, 7 }
 0xdde   :  { %v1835_v8 = vpop.permute.xlu0 %1834  ;;  %v1863_v12 = vrot.slane %v1847_v48, 3 }
 0xddf   :  { %v1829_v42 = vpop.permute.xlu1 %1828  ;;  %v1852_v32 = vmul.f32 %v4527_v43, %v1835_v8 }
 0xde0   :  { %v1864_v15 = vsel %vm512_vm2, %v1863_v12, %v1862_v38  ;;  %v1849_v2 = vmul.f32 %v4531_v22, %v1829_v42 }
 0xde1   :  { %v1866_v29 = vsel %vm515_vm3, %v1865_v21, %v1864_v15  ;;  %v1872_v54 = vrot.slane %v1852_v32, 6 }
 0xde2   :  { %v1867_v60 = vrot.slane %v1849_v2, 1 }
 0xde3   :  { %v1837_v35 = vpop.permute.xlu1 %1836 }
 0xde4   :  { %v1868_v16 = vsel %vm518_vm4, %v1867_v60, %v1866_v29  ;;  %v1853_v26 = vmul.f32 %v4536_v34, %v1837_v35 }
 0xde5   :  { %v1869_v13 = vsel %vm521_vm5, %v1850_v23, %v1868_v16 }
 0xde6   :  { %v1871_v43 = vsel %vm524_vm6, %v1870_v5, %v1869_v13  ;;  %v1874_v45 = vrot.slane %v1853_v26, 5 }
 0xde7   :  { %v1873_v30 = vsel %vm527_vm7, %v1872_v54, %v1871_v43 }
 0xde8   :  { %v1875_v22 = vsel %vm530_vm8, %v1874_v45, %v1873_v30 }
 0xde9   :  { %1876 = vrot.lane.b32.xlu0 %v1875_v22, %s3876_s30 }
 0xe5b   :  { %v4604_v49 = vpop.permute.xlu0 %1876 }
 0xe5c   :  { %3169 = vmatmul.mubr.msk.f32.vlgmr.msra.gmra.mrb[6].mxu1 %vm80_vm1, %v4604_v49 }
 0xe5d   :  { %3245 = vmatpush3.bf16.msra.mxu1 %v3964_v9  ;;  %3190 = vmatprep.mubr.msk.f32.mxu1 %vm3873_vm0, %v3874_v1 }
 0xe5e   :  { %3246 = vmatprep.subr.bf16.mxu1 %v3872_v0 }
 0xe61   :  { %3248 = vmatpush3.bf16.msra.mxu1 %v3968_v14 }
 0xf2f   :  { %v1946_v57 = vpop.f32.mrb[6].mxu1 }
 0xf30   :  { %v1951_v34 = vrot.slane %v1946_v57, 3  ;;  %v3170_v4 = vpop.f32.mrb[7].mxu1  ;;  %v1952_v50 = vrot.slane %v1946_v57, 4  ;;  %v1953_v11 = vrot.slane %v1946_v57, 5  ;;  %v1954_v62 = vrot.slane %v1946_v57, 6 }
 0xf31   :  { %v1955_v27 = vrot.slane %v1946_v57, 7  ;;  %v1956_v41 = vrot.slane %v1946_v57, 1  ;;  %v1957_v58 = vrot.slane %v1946_v57, 2  ;;  %v1971_v24 = vadd.f32 %v1946_v57, %v4008_v40 }
 0xf32   :  { %v1966_v18 = vadd.f32 %v1951_v34, %v3999_v28  ;;  %v1967_v3 = vadd.f32 %v1952_v50, %v3997_v25  ;;  %v1968_v9 = vadd.f32 %v1953_v11, %v4005_v37  ;;  %v1969_v1 = vadd.f32 %v1954_v62, %v4002_v33 }
 0xf33   :  { %v1970_v14 = vadd.f32 %v1955_v27, %v4011_v44  ;;  %v1972_v61 = vadd.f32 %v1956_v41, %v4015_v51  ;;  %v1973_v17 = vadd.f32 %v1957_v58, %v4017_v52  ;;  %v3012_v23 = vmul.f32 -1.442695, %v1971_v24 }
 0xf34   :  { %3581 = vtanh.f32 %v1966_v18  ;;  %v3007_v6 = vmul.f32 -1.442695, %v1966_v18  ;;  %v3008_v42 = vmul.f32 -1.442695, %v1967_v3  ;;  %v3009_v32 = vmul.f32 -1.442695, %v1968_v9 }
 0xf35   :  { %3583 = vtanh.f32 %v1967_v3  ;;  %v3010_v15 = vmul.f32 -1.442695, %v1969_v1  ;;  %v3011_v29 = vmul.f32 -1.442695, %v1970_v14  ;;  %v3013_v60 = vmul.f32 -1.442695, %v1972_v61 }
 0xf36   :  { %3585 = vtanh.f32 %v1968_v9  ;;  %v3014_v35 = vmul.f32 -1.442695, %v1973_v17 }
 0xf37   :  { %3587 = vtanh.f32 %v1969_v1 }
 0xf38   :  { %3589 = vtanh.f32 %v1970_v14 }
 0xf39   :  { %3591 = vtanh.f32 %v1972_v61 }
 0xf3a   :  { %3593 = vtanh.f32 %v1971_v24 }
 0xf3b   :  { %3595 = vtanh.f32 %v1973_v17 }
 0xf3c   :  { %3597 = vpow2.f32 %v3007_v6 }
 0xf3d   :  { %3599 = vpow2.f32 %v3008_v42 }
 0xf3e   :  { %v3582_v0 = vpop.eup %3581  ;;  %3601 = vpow2.f32 %v3009_v32 }
 0xf3f   :  { %2070 = vrot.lane.b32.xlu1 %v3582_v0, %s3875_s3  ;;  %v3584_v20 = vpop.eup %3583  ;;  %3603 = vpow2.f32 %v3010_v15 }
 0xf40   :  { %v3586_v63 = vpop.eup %3585  ;;  %2072 = vrot.lane.b32.xlu0 %v3584_v20, %s3875_s3  ;;  %3605 = vpow2.f32 %v3011_v29  ;;  %v2038_v29 = vrot.slane %v4542_v59, 7 }
 0xf41   :  { %v3588_v48 = vpop.eup %3587  ;;  %3607 = vpow2.f32 %v3013_v60 }
 0xf42   :  { %v3590_v21 = vpop.eup %3589 }
 0xf43   :  { %2074 = vrot.lane.b32.xlu1 %v3586_v63, %s3875_s3  ;;  %v3592_v8 = vpop.eup %3591 }
 0xf44   :  { %2076 = vrot.lane.b32.xlu0 %v3588_v48, %s3875_s3  ;;  %v3594_v38 = vpop.eup %3593 }
 0xf45   :  { %v3596_v12 = vpop.eup %3595 }
 0xf46   :  { %v3598_v2 = vpop.eup %3597 }
 0xf47   :  { %2078 = vrot.lane.b32.xlu1 %v3590_v21, %s3875_s3  ;;  %v1998_v5 = vadd.f32 1.0, %v3598_v2  ;;  %v3600_v54 = vpop.eup %3599 }
 0xf48   :  { %2082 = vrot.lane.b32.xlu0 %v3592_v8, %s3875_s3  ;;  %v3602_v16 = vpop.eup %3601  ;;  %v1999_v26 = vadd.f32 1.0, %v3600_v54  ;;  %v2040_v54 = vrot.slane %v4550_v39, 7 }
 0xf49   :  { %3609 = vrcp.f32 %v1998_v5  ;;  %v3604_v13 = vpop.eup %3603  ;;  %v2000_v43 = vadd.f32 1.0, %v3602_v16 }
 0xf4a   :  { %3611 = vpow2.f32 %v3012_v23  ;;  %v3606_v45 = vpop.eup %3605  ;;  %v2001_v22 = vadd.f32 1.0, %v3604_v13 }
 0xf4b   :  { %2080 = vrot.lane.b32.xlu1 %v3594_v38, %s3875_s3  ;;  %3613 = vpow2.f32 %v3014_v35  ;;  %v3608_v30 = vpop.eup %3607  ;;  %v2002_v4 = vadd.f32 1.0, %v3606_v45  ;;  %v2039_v35 = vrot.slane %v4564_v47, 7 }
 0xf4c   :  { %2084 = vrot.lane.b32.xlu0 %v3596_v12, %s3875_s3  ;;  %3615 = vrcp.f32 %v1999_v26  ;;  %v2004_v11 = vadd.f32 1.0, %v3608_v30  ;;  %v2042_v30 = vrot.slane %v4553_v19, 7  ;;  %v2043_v19 = vrot.slane %v4561_v7, 7 }
 0xf4d   :  { %3617 = vrcp.f32 %v2000_v43  ;;  %v2041_v43 = vrot.slane %v4573_v31, 7 }
 0xf4e   :  { %3619 = vrcp.f32 %v2001_v22 }
 0xf4f   :  { %3621 = vrcp.f32 %v2002_v4 }
 0xf50   :  { %3623 = vrcp.f32 %v2004_v11 }
 0xf53   :  { %v4629_v57 = vpop.eup %3609 }
 0xf54   :  { %v3612_v18 = vpop.eup %3611  ;;  %v2054_v60 = vmul.f32 %v4629_v57, %v2038_v29 }
 0xf55   :  { %v3614_v62 = vpop.eup %3613  ;;  %v2003_v3 = vadd.f32 1.0, %v3612_v18  ;;  %v2044_v18 = vrot.slane %v4570_v56, 7  ;;  %v2045_v56 = vrot.slane %v4579_v46, 7 }
 0xf56   :  { %v2005_v27 = vadd.f32 1.0, %v3614_v62  ;;  %v4633_v9 = vpop.eup %3615 }
 0xf57   :  { %3625 = vrcp.f32 %v2003_v3  ;;  %v4635_v1 = vpop.eup %3617  ;;  %v2055_v16 = vmul.f32 %v4633_v9, %v2039_v35 }
 0xf58   :  { %3627 = vrcp.f32 %v2005_v27  ;;  %v4640_v61 = vpop.eup %3619  ;;  %v2056_v13 = vmul.f32 %v4635_v1, %v2040_v54 }
 0xf59   :  { %v4643_v17 = vpop.eup %3621  ;;  %v2057_v47 = vmul.f32 %v4640_v61, %v2041_v43 }
 0xf5a   :  { %v4648_v21 = vpop.eup %3623  ;;  %v2058_v4 = vmul.f32 %v4643_v17, %v2042_v30 }
 0xf5b   :  { %v2060_v62 = vmul.f32 %v4648_v21, %v2044_v18 }
 0xf61   :  { %v4651_v38 = vpop.eup %3625 }
 0xf62   :  { %v4656_v32 = vpop.eup %3627  ;;  %v2059_v27 = vmul.f32 %v4651_v38, %v2043_v19 }
 0xf63   :  { %v2061_v7 = vmul.f32 %v4656_v32, %v2045_v56 }
 0xfb1   :  { %v2071_v34 = vpop.permute.xlu1 %2070 }
 0xfb2   :  { %v2094_v50 = vmul.f32 %v4629_v57, %v2071_v34  ;;  %v2073_v41 = vpop.permute.xlu0 %2072 }
 0xfb3   :  { %v2095_v0 = vmul.f32 %v4633_v9, %v2073_v41 }
 0xfb4   :  { %2110 = vrot.lane.b32.xlu1 %v2094_v50, %s3876_s30 }
 0xfb5   :  { %v2075_v14 = vpop.permute.xlu1 %2074  ;;  %2112 = vrot.lane.b32.xlu0 %v2095_v0, %s3876_s30 }
 0xfb6   :  { %v2096_v58 = vmul.f32 %v4635_v1, %v2075_v14  ;;  %v2077_v24 = vpop.permute.xlu0 %2076 }
 0xfb7   :  { %v2097_v20 = vmul.f32 %v4640_v61, %v2077_v24 }
 0xfb8   :  { %2114 = vrot.lane.b32.xlu1 %v2096_v58, %s3876_s30 }
 0xfb9   :  { %v2079_v63 = vpop.permute.xlu1 %2078  ;;  %2116 = vrot.lane.b32.xlu0 %v2097_v20, %s3876_s30 }
 0xfba   :  { %v2098_v48 = vmul.f32 %v4643_v17, %v2079_v63  ;;  %v2083_v8 = vpop.permute.xlu0 %2082 }
 0xfbb   :  { %v2100_v12 = vmul.f32 %v4648_v21, %v2083_v8 }
 0xfbc   :  { %2118 = vrot.lane.b32.xlu1 %v2098_v48, %s3876_s30 }
 0xfbd   :  { %v2081_v6 = vpop.permute.xlu1 %2080  ;;  %2122 = vrot.lane.b32.xlu0 %v2100_v12, %s3876_s30 }
 0xfbe   :  { %v2099_v42 = vmul.f32 %v4651_v38, %v2081_v6  ;;  %v2085_v15 = vpop.permute.xlu0 %2084 }
 0xfbf   :  { %v2101_v2 = vmul.f32 %v4656_v32, %v2085_v15 }
 0xfc0   :  { %2120 = vrot.lane.b32.xlu1 %v2099_v42, %s3876_s30 }
 0xfc1   :  { %2124 = vrot.lane.b32.xlu0 %v2101_v2, %s3876_s30 }
0x1026   :  { %v2111_v5 = vpop.permute.xlu1 %2110 }
0x1027   :  { %v4663_v23 = vadd.f32 %v2111_v5, %v2054_v60  ;;  %v2113_v26 = vpop.permute.xlu0 %2112 }
0x1028   :  { %v4671_v45 = vadd.f32 %v2113_v26, %v2055_v16 }
0x1029   :  { %3629 = vtanh.f32 %v4663_v23 }
0x102a   :  { %v2115_v59 = vpop.permute.xlu1 %2114  ;;  %3631 = vtanh.f32 %v4671_v45 }
0x102b   :  { %v4674_v22 = vadd.f32 %v2115_v59, %v2056_v13  ;;  %v2117_v39 = vpop.permute.xlu0 %2116 }
0x102c   :  { %v4681_v31 = vadd.f32 %v2117_v39, %v2057_v47 }
0x102d   :  { %3633 = vtanh.f32 %v4674_v22 }
0x102e   :  { %v2119_v50 = vpop.permute.xlu1 %2118  ;;  %3635 = vtanh.f32 %v4681_v31 }
0x102f   :  { %v4685_v11 = vadd.f32 %v2119_v50, %v2058_v4  ;;  %v2123_v3 = vpop.permute.xlu0 %2122 }
0x1030   :  { %v4692_v41 = vadd.f32 %v2123_v3, %v2060_v62 }
0x1031   :  { %3637 = vtanh.f32 %v4685_v11 }
0x1032   :  { %v2121_v0 = vpop.permute.xlu1 %2120  ;;  %3639 = vtanh.f32 %v4692_v41 }
0x1033   :  { %v3630_v34 = vpop.eup %3629  ;;  %v4694_v14 = vadd.f32 %v2121_v0, %v2059_v27  ;;  %v2125_v58 = vpop.permute.xlu0 %2124 }
0x1034   :  { %2158 = vrot.lane.b32.xlu1 %v3630_v34, %s3875_s3  ;;  %v3632_v24 = vpop.eup %3631  ;;  %v4699_v20 = vadd.f32 %v2125_v58, %v2061_v7 }
0x1035   :  { %3641 = vtanh.f32 %v4694_v14  ;;  %2160 = vrot.lane.b32.xlu0 %v3632_v24, %s3875_s3 }
0x1036   :  { %3643 = vtanh.f32 %v4699_v20 }
0x1037   :  { %v3634_v63 = vpop.eup %3633 }
0x1038   :  { %2162 = vrot.lane.b32.xlu1 %v3634_v63, %s3875_s3  ;;  %v3636_v46 = vpop.eup %3635 }
0x1039   :  { %2164 = vrot.lane.b32.xlu0 %v3636_v46, %s3875_s3 }
0x103b   :  { %v3638_v48 = vpop.eup %3637 }
0x103c   :  { %2166 = vrot.lane.b32.xlu1 %v3638_v48, %s3875_s3  ;;  %v3640_v8 = vpop.eup %3639 }
0x103d   :  { %2170 = vrot.lane.b32.xlu0 %v3640_v8, %s3875_s3 }
0x103f   :  { %v3642_v12 = vpop.eup %3641 }
0x1040   :  { %2168 = vrot.lane.b32.xlu1 %v3642_v12, %s3875_s3  ;;  %v3644_v6 = vpop.eup %3643 }
0x1041   :  { %2172 = vrot.lane.b32.xlu0 %v3644_v6, %s3875_s3 }
0x10a6   :  { %v2159_v42 = vpop.permute.xlu1 %2158 }
0x10a7   :  { %v2182_v15 = vmul.f32 %v4629_v57, %v2159_v42  ;;  %v2161_v2 = vpop.permute.xlu0 %2160 }
0x10a8   :  { %v2183_v29 = vmul.f32 %v4633_v9, %v2161_v2 }
0x10a9   :  { %v2198_v60 = vrot.slane %v2182_v15, 5 }
0x10aa   :  { %v2163_v5 = vpop.permute.xlu1 %2162  ;;  %v2199_v54 = vrot.slane %v2183_v29, 4 }
0x10ab   :  { %v2184_v35 = vmul.f32 %v4635_v1, %v2163_v5  ;;  %v2165_v16 = vpop.permute.xlu0 %2164 }
0x10ac   :  { %v2200_v13 = vsel %vm512_vm2, %v2199_v54, %v2198_v60  ;;  %v2185_v43 = vmul.f32 %v4640_v61, %v2165_v16 }
0x10ad   :  { %v2201_v26 = vrot.slane %v2184_v35, 3 }
0x10ae   :  { %v2167_v59 = vpop.permute.xlu1 %2166  ;;  %v2203_v57 = vrot.slane %v2185_v43, 2 }
0x10af   :  { %v2202_v30 = vsel %vm515_vm3, %v2201_v26, %v2200_v13  ;;  %v2186_v47 = vmul.f32 %v4643_v17, %v2167_v59  ;;  %v2171_v34 = vpop.permute.xlu0 %2170 }
0x10b0   :  { %v2188_v9 = vmul.f32 %v4648_v21, %v2171_v34  ;;  %v2204_v4 = vsel %vm518_vm4, %v2203_v57, %v2202_v30 }
0x10b1   :  { %v2205_v39 = vrot.slane %v2186_v47, 1 }
0x10b2   :  { %v2169_v1 = vpop.permute.xlu1 %2168  ;;  %v2208_v19 = vrot.slane %v2188_v9, 7 }
0x10b3   :  { %v2206_v18 = vsel %vm521_vm5, %v2205_v39, %v2204_v4  ;;  %v2187_v50 = vmul.f32 %v4651_v38, %v2169_v1  ;;  %v2173_v62 = vpop.permute.xlu0 %2172 }
0x10b4   :  { %v2189_v3 = vmul.f32 %v4656_v32, %v2173_v62 }
0x10b5   :  { %v2207_v61 = vsel %vm524_vm6, %v2187_v50, %v2206_v18 }
0x10b6   :  { %v2209_v17 = vsel %vm527_vm7, %v2208_v19, %v2207_v61  ;;  %v2210_v27 = vrot.slane %v2189_v3, 6 }
0x10b8   :  { %v4724_v56 = vsel %vm530_vm8, %v2210_v27, %v2209_v17 }
0x10b9   :  { %2212 = vrot.lane.b32.xlu1 %v4724_v56, %s3876_s30 }
0x112b   :  { %v2213_v21 = vpop.permute.xlu1 %2212 }
0x112c   :  { %3180 = vmatmul.mubr.msk.f32.vlgmr.msra.gmra.mrb[12].mxu0 %vm80_vm1, %v2213_v21 }
0x11ff   :  { %v2282_v0 = vpop.f32.mrb[12].mxu0 }
0x1200   :  { %v2287_v38 = vrot.slane %v2282_v0, 2  ;;  %v3181_v7 = vpop.f32.mrb[13].mxu0  ;;  %v2288_v24 = vrot.slane %v2282_v0, 3  ;;  %v2289_v32 = vrot.slane %v2282_v0, 4  ;;  %v2290_v63 = vrot.slane %v2282_v0, 5 }
0x1201   :  { %v2291_v48 = vrot.slane %v2282_v0, 6  ;;  %v2292_v12 = vrot.slane %v2282_v0, 7  ;;  %v2293_v15 = vrot.slane %v2282_v0, 1  ;;  %v2308_v5 = vadd.f32 %v2282_v0, %v4015_v51 }
0x1202   :  { %v2302_v58 = vadd.f32 %v2287_v38, %v3999_v28  ;;  %v2303_v46 = vadd.f32 %v2288_v24, %v3997_v25  ;;  %v2304_v8 = vadd.f32 %v2289_v32, %v4005_v37  ;;  %v2305_v6 = vadd.f32 %v2290_v63, %v4002_v33 }
0x1203   :  { %v2306_v2 = vadd.f32 %v2291_v48, %v4011_v44  ;;  %v2307_v29 = vadd.f32 %v2292_v12, %v4008_v40  ;;  %v2309_v60 = vadd.f32 %v2293_v15, %v4017_v52  ;;  %v3022_v50 = vmul.f32 -1.442695, %v2308_v5 }
0x1204   :  { %3645 = vtanh.f32 %v2302_v58  ;;  %v3016_v30 = vmul.f32 -1.442695, %v2302_v58  ;;  %v3017_v47 = vmul.f32 -1.442695, %v2303_v46  ;;  %v3018_v57 = vmul.f32 -1.442695, %v2304_v8 }
0x1205   :  { %3647 = vtanh.f32 %v2303_v46  ;;  %v3019_v34 = vmul.f32 -1.442695, %v2305_v6  ;;  %v3020_v9 = vmul.f32 -1.442695, %v2306_v2  ;;  %v3021_v4 = vmul.f32 -1.442695, %v2307_v29 }
0x1206   :  { %3649 = vtanh.f32 %v2304_v8  ;;  %v3023_v18 = vmul.f32 -1.442695, %v2309_v60 }
0x1207   :  { %3651 = vtanh.f32 %v2305_v6 }
0x1208   :  { %3653 = vtanh.f32 %v2306_v2 }
0x1209   :  { %3655 = vtanh.f32 %v2307_v29 }
0x120a   :  { %3657 = vtanh.f32 %v2309_v60 }
0x120b   :  { %3659 = vtanh.f32 %v2308_v5 }
0x120c   :  { %3661 = vpow2.f32 %v3016_v30 }
0x120d   :  { %3663 = vpow2.f32 %v3017_v47 }
0x120e   :  { %v3646_v42 = vpop.eup %3645  ;;  %3665 = vpow2.f32 %v3018_v57 }
0x120f   :  { %2406 = vrot.lane.b32.xlu0 %v3646_v42, %s3875_s3  ;;  %v3648_v35 = vpop.eup %3647  ;;  %3667 = vpow2.f32 %v3019_v34 }
0x1210   :  { %v3650_v54 = vpop.eup %3649  ;;  %2408 = vrot.lane.b32.xlu1 %v3648_v35, %s3875_s3  ;;  %3669 = vpow2.f32 %v3020_v9 }
0x1211   :  { %v3652_v16 = vpop.eup %3651  ;;  %3671 = vpow2.f32 %v3021_v4  ;;  %v2374_v4 = vrot.slane %v4663_v23, 7 }
0x1212   :  { %v3654_v26 = vpop.eup %3653 }
0x1213   :  { %2410 = vrot.lane.b32.xlu0 %v3650_v54, %s3875_s3  ;;  %v3656_v13 = vpop.eup %3655 }
0x1214   :  { %2412 = vrot.lane.b32.xlu1 %v3652_v16, %s3875_s3  ;;  %v3658_v43 = vpop.eup %3657 }
0x1215   :  { %v3660_v59 = vpop.eup %3659 }
0x1216   :  { %v3662_v39 = vpop.eup %3661 }
0x1217   :  { %2414 = vrot.lane.b32.xlu0 %v3654_v26, %s3875_s3  ;;  %v2334_v1 = vadd.f32 1.0, %v3662_v39  ;;  %v3664_v19 = vpop.eup %3663 }
0x1218   :  { %2416 = vrot.lane.b32.xlu1 %v3656_v13, %s3875_s3  ;;  %v3666_v62 = vpop.eup %3665  ;;  %v2335_v61 = vadd.f32 1.0, %v3664_v19  ;;  %v2375_v19 = vrot.slane %v4671_v45, 7 }
0x1219   :  { %3673 = vrcp.f32 %v2334_v1  ;;  %v3668_v3 = vpop.eup %3667  ;;  %v2336_v17 = vadd.f32 1.0, %v3666_v62  ;;  %v2376_v62 = vrot.slane %v4674_v22, 7 }
0x121a   :  { %3675 = vpow2.f32 %v3023_v18  ;;  %v3670_v27 = vpop.eup %3669  ;;  %v2337_v0 = vadd.f32 1.0, %v3668_v3 }
0x121b   :  { %2420 = vrot.lane.b32.xlu0 %v3658_v43, %s3875_s3  ;;  %3677 = vpow2.f32 %v3022_v50  ;;  %v3672_v21 = vpop.eup %3671  ;;  %v2338_v58 = vadd.f32 1.0, %v3670_v27  ;;  %v2377_v27 = vrot.slane %v4681_v31, 7 }
0x121c   :  { %2418 = vrot.lane.b32.xlu1 %v3660_v59, %s3875_s3  ;;  %3679 = vrcp.f32 %v2335_v61  ;;  %v2339_v63 = vadd.f32 1.0, %v3672_v21 }
0x121d   :  { %3681 = vrcp.f32 %v2336_v17 }
0x121e   :  { %3683 = vrcp.f32 %v2337_v0  ;;  %v2378_v0 = vrot.slane %v4685_v11, 7  ;;  %v2381_v11 = vrot.slane %v4699_v20, 7 }
0x121f   :  { %3685 = vrcp.f32 %v2338_v58 }
0x1220   :  { %3687 = vrcp.f32 %v2339_v63 }
0x1223   :  { %v4745_v38 = vpop.eup %3673 }
0x1224   :  { %v3676_v24 = vpop.eup %3675  ;;  %v2390_v1 = vmul.f32 %v4745_v38, %v2374_v4 }
0x1225   :  { %v3678_v46 = vpop.eup %3677  ;;  %v2341_v48 = vadd.f32 1.0, %v3676_v24 }
0x1226   :  { %v2340_v8 = vadd.f32 1.0, %v3678_v46  ;;  %v4749_v12 = vpop.eup %3679 }
0x1227   :  { %3689 = vrcp.f32 %v2341_v48  ;;  %v4751_v42 = vpop.eup %3681  ;;  %v2391_v61 = vmul.f32 %v4749_v12, %v2375_v19 }
0x1228   :  { %3691 = vrcp.f32 %v2340_v8  ;;  %v4756_v60 = vpop.eup %3683  ;;  %v2392_v17 = vmul.f32 %v4751_v42, %v2376_v62 }
0x1229   :  { %v4759_v35 = vpop.eup %3685  ;;  %v2393_v45 = vmul.f32 %v4756_v60, %v2377_v27 }
0x122a   :  { %v4764_v13 = vpop.eup %3687  ;;  %v2394_v24 = vmul.f32 %v4759_v35, %v2378_v0 }
0x1231   :  { %v4767_v59 = vpop.eup %3689 }
0x1232   :  { %v4772_v34 = vpop.eup %3691 }
0x1281   :  { %v2407_v7 = vpop.permute.xlu0 %2406 }
0x1282   :  { %v2430_v32 = vmul.f32 %v4745_v38, %v2407_v7  ;;  %v2409_v6 = vpop.permute.xlu1 %2408 }
0x1283   :  { %v2431_v15 = vmul.f32 %v4749_v12, %v2409_v6  ;;  %v2397_v6 = vmul.f32 %v4767_v59, %v2381_v11 }
0x1284   :  { %2446 = vrot.lane.b32.xlu0 %v2430_v32, %s3876_s30  ;;  %v2379_v32 = vrot.slane %v4694_v14, 7  ;;  %v2380_v14 = vrot.slane %v4692_v41, 7 }
0x1285   :  { %v2411_v2 = vpop.permute.xlu0 %2410  ;;  %2448 = vrot.lane.b32.xlu1 %v2431_v15, %s3876_s30 }
0x1286   :  { %v2432_v29 = vmul.f32 %v4751_v42, %v2411_v2  ;;  %v2413_v5 = vpop.permute.xlu1 %2412  ;;  %v2395_v48 = vmul.f32 %v4764_v13, %v2379_v32  ;;  %v2396_v20 = vmul.f32 %v4772_v34, %v2380_v14 }
0x1287   :  { %v2433_v54 = vmul.f32 %v4756_v60, %v2413_v5 }
0x1288   :  { %2450 = vrot.lane.b32.xlu0 %v2432_v29, %s3876_s30 }
0x1289   :  { %v2415_v16 = vpop.permute.xlu0 %2414  ;;  %2452 = vrot.lane.b32.xlu1 %v2433_v54, %s3876_s30 }
0x128a   :  { %v2434_v26 = vmul.f32 %v4759_v35, %v2415_v16  ;;  %v2417_v43 = vpop.permute.xlu1 %2416 }
0x128b   :  { %v2435_v30 = vmul.f32 %v4764_v13, %v2417_v43 }
0x128c   :  { %2454 = vrot.lane.b32.xlu0 %v2434_v26, %s3876_s30 }
0x128d   :  { %v2421_v47 = vpop.permute.xlu0 %2420  ;;  %2456 = vrot.lane.b32.xlu1 %v2435_v30, %s3876_s30 }
0x128e   :  { %v2437_v57 = vmul.f32 %v4767_v59, %v2421_v47  ;;  %v2419_v39 = vpop.permute.xlu1 %2418 }
0x128f   :  { %v2436_v9 = vmul.f32 %v4772_v34, %v2419_v39 }
0x1290   :  { %2460 = vrot.lane.b32.xlu0 %v2437_v57, %s3876_s30 }
0x1291   :  { %2458 = vrot.lane.b32.xlu1 %v2436_v9, %s3876_s30 }
0x12f6   :  { %v2447_v18 = vpop.permute.xlu0 %2446 }
0x12f7   :  { %v4779_v50 = vadd.f32 %v2447_v18, %v2390_v1  ;;  %v2449_v3 = vpop.permute.xlu1 %2448 }
0x12f8   :  { %v4787_v21 = vadd.f32 %v2449_v3, %v2391_v61 }
0x12f9   :  { %3693 = vtanh.f32 %v4779_v50 }
0x12fa   :  { %v2451_v23 = vpop.permute.xlu0 %2450  ;;  %3695 = vtanh.f32 %v4787_v21 }
0x12fb   :  { %v4790_v7 = vadd.f32 %v2451_v23, %v2392_v17  ;;  %v2453_v22 = vpop.permute.xlu1 %2452 }
0x12fc   :  { %v4797_v31 = vadd.f32 %v2453_v22, %v2393_v45 }
0x12fd   :  { %3697 = vtanh.f32 %v4790_v7 }
0x12fe   :  { %v2455_v63 = vpop.permute.xlu0 %2454  ;;  %3699 = vtanh.f32 %v4797_v31 }
0x12ff   :  { %v4801_v46 = vadd.f32 %v2455_v63, %v2394_v24  ;;  %v2457_v8 = vpop.permute.xlu1 %2456 }
0x1300   :  { %v4808_v15 = vadd.f32 %v2457_v8, %v2395_v48 }
0x1301   :  { %3701 = vtanh.f32 %v4801_v46 }
0x1302   :  { %v2461_v2 = vpop.permute.xlu0 %2460  ;;  %3703 = vtanh.f32 %v4808_v15 }
0x1303   :  { %v3694_v58 = vpop.eup %3693  ;;  %v4810_v29 = vadd.f32 %v2461_v2, %v2397_v6  ;;  %v2459_v5 = vpop.permute.xlu1 %2458 }
0x1304   :  { %2494 = vrot.lane.b32.xlu0 %v3694_v58, %s3875_s3  ;;  %v3696_v54 = vpop.eup %3695  ;;  %v4815_v16 = vadd.f32 %v2459_v5, %v2396_v20 }
0x1305   :  { %3705 = vtanh.f32 %v4810_v29  ;;  %2496 = vrot.lane.b32.xlu1 %v3696_v54, %s3875_s3 }
0x1306   :  { %3707 = vtanh.f32 %v4815_v16 }
0x1307   :  { %v3698_v26 = vpop.eup %3697 }
0x1308   :  { %2498 = vrot.lane.b32.xlu0 %v3698_v26, %s3875_s3  ;;  %v3700_v41 = vpop.eup %3699 }
0x1309   :  { %2500 = vrot.lane.b32.xlu1 %v3700_v41, %s3875_s3 }
0x130b   :  { %v3702_v43 = vpop.eup %3701 }
0x130c   :  { %2502 = vrot.lane.b32.xlu0 %v3702_v43, %s3875_s3  ;;  %v3704_v30 = vpop.eup %3703 }
0x130d   :  { %2504 = vrot.lane.b32.xlu1 %v3704_v30, %s3875_s3 }
0x130f   :  { %v3706_v47 = vpop.eup %3705 }
0x1310   :  { %2508 = vrot.lane.b32.xlu0 %v3706_v47, %s3875_s3  ;;  %v3708_v57 = vpop.eup %3707 }
0x1311   :  { %2506 = vrot.lane.b32.xlu1 %v3708_v57, %s3875_s3 }
0x1376   :  { %v2495_v39 = vpop.permute.xlu0 %2494 }
0x1377   :  { %v2518_v9 = vmul.f32 %v4745_v38, %v2495_v39  ;;  %v2497_v4 = vpop.permute.xlu1 %2496 }
0x1378   :  { %v2519_v1 = vmul.f32 %v4749_v12, %v2497_v4 }
0x1379   :  { %v2534_v18 = vrot.slane %v2518_v9, 6 }
0x137a   :  { %v2499_v19 = vpop.permute.xlu0 %2498  ;;  %v2535_v61 = vrot.slane %v2519_v1, 5 }
0x137b   :  { %v2520_v62 = vmul.f32 %v4751_v42, %v2499_v19  ;;  %v2501_v3 = vpop.permute.xlu1 %2500 }
0x137c   :  { %v2536_v27 = vsel %vm512_vm2, %v2535_v61, %v2534_v18  ;;  %v2521_v23 = vmul.f32 %v4756_v60, %v2501_v3 }
0x137d   :  { %v2537_v17 = vrot.slane %v2520_v62, 4 }
0x137e   :  { %v2503_v0 = vpop.permute.xlu0 %2502  ;;  %v2539_v38 = vrot.slane %v2521_v23, 3 }
0x137f   :  { %v2538_v45 = vsel %vm515_vm3, %v2537_v17, %v2536_v27  ;;  %v2522_v58 = vmul.f32 %v4759_v35, %v2503_v0  ;;  %v2505_v22 = vpop.permute.xlu1 %2504 }
0x1380   :  { %v2523_v12 = vmul.f32 %v4764_v13, %v2505_v22  ;;  %v2540_v32 = vsel %vm518_vm4, %v2539_v38, %v2538_v45 }
0x1381   :  { %v2541_v24 = vrot.slane %v2522_v58, 2 }
0x1382   :  { %v2509_v42 = vpop.permute.xlu0 %2508  ;;  %v2543_v48 = vrot.slane %v2523_v12, 1 }
0x1383   :  { %v2542_v63 = vsel %vm521_vm5, %v2541_v24, %v2540_v32  ;;  %v2525_v11 = vmul.f32 %v4767_v59, %v2509_v42  ;;  %v2507_v8 = vpop.permute.xlu1 %2506 }
0x1384   :  { %v2524_v6 = vmul.f32 %v4772_v34, %v2507_v8  ;;  %v2544_v14 = vsel %vm524_vm6, %v2543_v48, %v2542_v63 }
0x1385   :  { %v2546_v60 = vrot.slane %v2525_v11, 7 }
0x1386   :  { %v2545_v35 = vsel %vm527_vm7, %v2524_v6, %v2544_v14 }
0x1387   :  { %v4840_v2 = vsel %vm530_vm8, %v2546_v60, %v2545_v35 }
0x1388   :  { %2548 = vrot.lane.b32.xlu0 %v4840_v2, %s3876_s30 }
0x13fa   :  { %v2549_v13 = vpop.permute.xlu0 %2548 }
0x13fb   :  { %3191 = vmatmul.mubr.msk.f32.vlgmr.msra.gmra.mrb[8].mxu1 %vm80_vm1, %v2549_v13 }
0x14ce   :  { %v2618_v20 = vpop.f32.mrb[8].mxu1 }
0x14cf   :  { %v3192_v59 = vpop.f32.mrb[9].mxu1  ;;  %v2624_v5 = vrot.slane %v2618_v20, 2  ;;  %v2625_v54 = vrot.slane %v2618_v20, 3  ;;  %v2626_v26 = vrot.slane %v2618_v20, 4  ;;  %v2627_v41 = vrot.slane %v2618_v20, 5 }
0x14d0   :  { %v2628_v30 = vrot.slane %v2618_v20, 6  ;;  %v2629_v57 = vrot.slane %v2618_v20, 7  ;;  %v2623_v4 = vrot.slane %v2618_v20, 1 }
0x14d1   :  { %v2639_v34 = vadd.f32 %v2624_v5, %v3997_v25  ;;  %v2640_v43 = vadd.f32 %v2625_v54, %v4005_v37  ;;  %v2641_v47 = vadd.f32 %v2626_v26, %v4002_v33  ;;  %v2642_v39 = vadd.f32 %v2627_v41, %v4011_v44 }
0x14d2   :  { %v2643_v9 = vadd.f32 %v2628_v30, %v4008_v40  ;;  %v2644_v1 = vadd.f32 %v2629_v57, %v4015_v51  ;;  %v2645_v25 = vadd.f32 %v2618_v20, %v4017_v52  ;;  %v2638_v37 = vadd.f32 %v2623_v4, %v3999_v28 }
0x14d3   :  { %3709 = vtanh.f32 %v2639_v34  ;;  %v3026_v62 = vmul.f32 -1.442695, %v2639_v34  ;;  %v3027_v61 = vmul.f32 -1.442695, %v2640_v43  ;;  %v3028_v3 = vmul.f32 -1.442695, %v2641_v47 }
0x14d4   :  { %3711 = vtanh.f32 %v2640_v43  ;;  %v3029_v17 = vmul.f32 -1.442695, %v2642_v39  ;;  %v3030_v27 = vmul.f32 -1.442695, %v2643_v9  ;;  %v3031_v23 = vmul.f32 -1.442695, %v2644_v1 }
0x14d5   :  { %3713 = vtanh.f32 %v2641_v47  ;;  %v3032_v0 = vmul.f32 -1.442695, %v2645_v25  ;;  %v3025_v45 = vmul.f32 -1.442695, %v2638_v37 }
0x14d6   :  { %3715 = vtanh.f32 %v2642_v39 }
0x14d7   :  { %3717 = vtanh.f32 %v2643_v9 }
0x14d8   :  { %3719 = vtanh.f32 %v2644_v1 }
0x14d9   :  { %3721 = vtanh.f32 %v2645_v25 }
0x14da   :  { %3723 = vtanh.f32 %v2638_v37 }
0x14db   :  { %3725 = vpow2.f32 %v3026_v62  ;;  %v2712_v62 = vrot.slane %v4790_v7, 7  ;;  %v2715_v7 = vrot.slane %v4808_v15, 7 }
0x14dc   :  { %3727 = vpow2.f32 %v3027_v61 }
0x14dd   :  { %v3710_v18 = vpop.eup %3709  ;;  %3729 = vpow2.f32 %v3028_v3 }
0x14de   :  { %v3712_v33 = vpop.eup %3711  ;;  %2744 = vrot.lane.b32.xlu1 %v3710_v18, %s3875_s3  ;;  %3731 = vpow2.f32 %v3029_v17 }
0x14df   :  { %2746 = vrot.lane.b32.xlu0 %v3712_v33, %s3875_s3  ;;  %v3714_v40 = vpop.eup %3713  ;;  %3733 = vpow2.f32 %v3030_v27  ;;  %v2713_v27 = vrot.slane %v4797_v31, 7 }
0x14e0   :  { %v3716_v44 = vpop.eup %3715  ;;  %3735 = vpow2.f32 %v3031_v23 }
0x14e1   :  { %v3718_v51 = vpop.eup %3717  ;;  %3737 = vpow2.f32 %v3032_v0 }
0x14e2   :  { %2748 = vrot.lane.b32.xlu1 %v3714_v40, %s3875_s3  ;;  %v3720_v52 = vpop.eup %3719  ;;  %3739 = vpow2.f32 %v3025_v45  ;;  %v2714_v45 = vrot.slane %v4801_v46, 7 }
0x14e3   :  { %2750 = vrot.lane.b32.xlu0 %v3716_v44, %s3875_s3  ;;  %v3722_v28 = vpop.eup %3721 }
0x14e4   :  { %v3724_v19 = vpop.eup %3723 }
0x14e5   :  { %v3726_v58 = vpop.eup %3725 }
0x14e6   :  { %2752 = vrot.lane.b32.xlu1 %v3718_v51, %s3875_s3  ;;  %v3728_v38 = vpop.eup %3727  ;;  %v2671_v22 = vadd.f32 1.0, %v3726_v58 }
0x14e7   :  { %2754 = vrot.lane.b32.xlu0 %v3720_v52, %s3875_s3  ;;  %v3730_v24 = vpop.eup %3729  ;;  %v2672_v12 = vadd.f32 1.0, %v3728_v38 }
0x14e8   :  { %v3732_v32 = vpop.eup %3731  ;;  %3741 = vrcp.f32 %v2671_v22  ;;  %v2673_v42 = vadd.f32 1.0, %v3730_v24 }
0x14e9   :  { %v3734_v63 = vpop.eup %3733  ;;  %3743 = vrcp.f32 %v2672_v12  ;;  %v2674_v11 = vadd.f32 1.0, %v3732_v32  ;;  %v2716_v32 = vrot.slane %v4815_v16, 7 }
0x14ea   :  { %2756 = vrot.lane.b32.xlu1 %v3722_v28, %s3875_s3  ;;  %v3736_v48 = vpop.eup %3735  ;;  %3745 = vrcp.f32 %v2673_v42  ;;  %v2675_v8 = vadd.f32 1.0, %v3734_v63 }
0x14eb   :  { %2742 = vrot.lane.b32.xlu0 %v3724_v19, %s3875_s3  ;;  %v3738_v60 = vpop.eup %3737  ;;  %3747 = vrcp.f32 %v2674_v11  ;;  %v2676_v6 = vadd.f32 1.0, %v3736_v48  ;;  %v2711_v19 = vrot.slane %v4787_v21, 7  ;;  %v2717_v11 = vrot.slane %v4810_v29, 7 }
0x14ec   :  { %v3740_v14 = vpop.eup %3739  ;;  %v2677_v35 = vadd.f32 1.0, %v3738_v60  ;;  %3749 = vrcp.f32 %v2675_v8  ;;  %v2710_v60 = vrot.slane %v4779_v50, 7 }
0x14ed   :  { %3751 = vrcp.f32 %v2676_v6  ;;  %v2670_v13 = vadd.f32 1.0, %v3740_v14 }
0x14ee   :  { %3753 = vrcp.f32 %v2677_v35 }
0x14ef   :  { %3755 = vrcp.f32 %v2670_v13 }
0x14f2   :  { %v4861_v20 = vpop.eup %3741 }
0x14f3   :  { %v4863_v5 = vpop.eup %3743  ;;  %v2727_v61 = vmul.f32 %v4861_v20, %v2711_v19 }
0x14f4   :  { %v4868_v41 = vpop.eup %3745  ;;  %v2728_v17 = vmul.f32 %v4863_v5, %v2712_v62 }
0x14f5   :  { %v4871_v30 = vpop.eup %3747  ;;  %v2729_v38 = vmul.f32 %v4868_v41, %v2713_v27 }
0x14f6   :  { %v4876_v9 = vpop.eup %3749  ;;  %v2730_v21 = vmul.f32 %v4871_v30, %v2714_v45 }
0x14f7   :  { %v4879_v1 = vpop.eup %3751  ;;  %v2731_v31 = vmul.f32 %v4876_v9, %v2715_v7 }
0x14f8   :  { %v4884_v33 = vpop.eup %3753  ;;  %v2732_v63 = vmul.f32 %v4879_v1, %v2716_v32 }
0x14f9   :  { %v4887_v44 = vpop.eup %3755  ;;  %v2733_v15 = vmul.f32 %v4884_v33, %v2717_v11 }
0x14fa   :  { %v2726_v14 = vmul.f32 %v4887_v44, %v2710_v60 }
0x1550   :  { %v2745_v59 = vpop.permute.xlu1 %2744 }
0x1551   :  { %v2747_v54 = vpop.permute.xlu0 %2746  ;;  %v2767_v26 = vmul.f32 %v4861_v20, %v2745_v59 }
0x1552   :  { %v2768_v34 = vmul.f32 %v4863_v5, %v2747_v54 }
0x1553   :  { %2784 = vrot.lane.b32.xlu1 %v2767_v26, %s3876_s30 }
0x1554   :  { %2786 = vrot.lane.b32.xlu0 %v2768_v34, %s3876_s30  ;;  %v2749_v43 = vpop.permute.xlu1 %2748 }
0x1555   :  { %v2751_v47 = vpop.permute.xlu0 %2750  ;;  %v2769_v57 = vmul.f32 %v4868_v41, %v2749_v43 }
0x1556   :  { %v2770_v39 = vmul.f32 %v4871_v30, %v2751_v47 }
0x1557   :  { %2788 = vrot.lane.b32.xlu1 %v2769_v57, %s3876_s30 }
0x1558   :  { %2790 = vrot.lane.b32.xlu0 %v2770_v39, %s3876_s30  ;;  %v2753_v4 = vpop.permute.xlu1 %2752 }
0x1559   :  { %v2755_v25 = vpop.permute.xlu0 %2754  ;;  %v2771_v37 = vmul.f32 %v4876_v9, %v2753_v4 }
0x155a   :  { %v2772_v18 = vmul.f32 %v4879_v1, %v2755_v25 }
0x155b   :  { %2792 = vrot.lane.b32.xlu1 %v2771_v37, %s3876_s30 }
0x155c   :  { %2794 = vrot.lane.b32.xlu0 %v2772_v18, %s3876_s30  ;;  %v2757_v40 = vpop.permute.xlu1 %2756 }
0x155d   :  { %v2773_v51 = vmul.f32 %v4884_v33, %v2757_v40  ;;  %v2743_v52 = vpop.permute.xlu0 %2742 }
0x155e   :  { %v2766_v28 = vmul.f32 %v4887_v44, %v2743_v52 }
0x155f   :  { %2796 = vrot.lane.b32.xlu1 %v2773_v51, %s3876_s30 }
0x1560   :  { %2782 = vrot.lane.b32.xlu0 %v2766_v28, %s3876_s30 }
0x15c5   :  { %v2785_v3 = vpop.permute.xlu1 %2784 }
0x15c6   :  { %v2807_v23 = vadd.f32 %v2785_v3, %v2727_v61  ;;  %v2787_v0 = vpop.permute.xlu0 %2786 }
0x15c7   :  { %v2808_v58 = vadd.f32 %v2787_v0, %v2728_v17 }
0x15c8   :  { %3757 = vtanh.f32 %v2807_v23 }
0x15c9   :  { %3759 = vtanh.f32 %v2808_v58  ;;  %v2789_v22 = vpop.permute.xlu1 %2788 }
0x15ca   :  { %v2809_v24 = vadd.f32 %v2789_v22, %v2729_v38  ;;  %v2791_v12 = vpop.permute.xlu0 %2790 }
0x15cb   :  { %v2810_v42 = vadd.f32 %v2791_v12, %v2730_v21 }
0x15cc   :  { %3761 = vtanh.f32 %v2809_v24 }
0x15cd   :  { %3763 = vtanh.f32 %v2810_v42  ;;  %v2793_v46 = vpop.permute.xlu1 %2792 }
0x15ce   :  { %v2811_v48 = vadd.f32 %v2793_v46, %v2731_v31  ;;  %v2795_v8 = vpop.permute.xlu0 %2794 }
0x15cf   :  { %v2812_v6 = vadd.f32 %v2795_v8, %v2732_v63 }
0x15d0   :  { %3765 = vtanh.f32 %v2811_v48 }
0x15d1   :  { %3767 = vtanh.f32 %v2812_v6  ;;  %v2797_v16 = vpop.permute.xlu1 %2796 }
0x15d2   :  { %v3758_v35 = vpop.eup %3757  ;;  %v2813_v13 = vadd.f32 %v2797_v16, %v2733_v15  ;;  %v2783_v59 = vpop.permute.xlu0 %2782 }
0x15d3   :  { %v3760_v54 = vpop.eup %3759  ;;  %v2806_v26 = vadd.f32 %v2783_v59, %v2726_v14  ;;  %2832 = vrot.lane.b32.xlu1 %v3758_v35, %s3875_s3 }
0x15d4   :  { %3769 = vtanh.f32 %v2813_v13  ;;  %2834 = vrot.lane.b32.xlu0 %v3760_v54, %s3875_s3 }
0x15d5   :  { %3771 = vtanh.f32 %v2806_v26 }
0x15d6   :  { %v3762_v50 = vpop.eup %3761 }
0x15d7   :  { %v3764_v29 = vpop.eup %3763  ;;  %2836 = vrot.lane.b32.xlu1 %v3762_v50, %s3875_s3 }
0x15d8   :  { %2838 = vrot.lane.b32.xlu0 %v3764_v29, %s3875_s3 }
0x15da   :  { %v3766_v34 = vpop.eup %3765 }
0x15db   :  { %v3768_v43 = vpop.eup %3767  ;;  %2840 = vrot.lane.b32.xlu1 %v3766_v34, %s3875_s3 }
0x15dc   :  { %2842 = vrot.lane.b32.xlu0 %v3768_v43, %s3875_s3 }
0x15de   :  { %v3770_v47 = vpop.eup %3769 }
0x15df   :  { %v3772_v57 = vpop.eup %3771  ;;  %2844 = vrot.lane.b32.xlu1 %v3770_v47, %s3875_s3 }
0x15e0   :  { %2830 = vrot.lane.b32.xlu0 %v3772_v57, %s3875_s3 }
0x15e3   :  { %2863 = vrot.lane.b32.xlu1 %v4238_v53, %s3875_s3 }
0x15e4   :  { %2871 = vrot.lane.b32.xlu0 %v4724_v56, %s3875_s3 }
0x15e7   :  { %2866 = vrot.lane.b32.xlu1 %v4360_v10, %s3877_s6 }
0x15e8   :  { %2874 = vrot.lane.b32.xlu0 %v4840_v2, %s3877_s6 }
0x1645   :  { %v2833_v39 = vpop.permute.xlu1 %2832 }
0x1646   :  { %v2855_v4 = vmul.f32 %v4861_v20, %v2833_v39  ;;  %v2835_v25 = vpop.permute.xlu0 %2834 }
0x1647   :  { %v2856_v37 = vmul.f32 %v4863_v5, %v2835_v25 }
0x1648   :  { %v2910_v18 = vrot.slane %v2855_v4, 7  ;;  %v2886_v38 = vrot.slane %v2855_v4, 6 }
0x1649   :  { %v2911_v40 = vrot.slane %v2856_v37, 6  ;;  %v2837_v51 = vpop.permute.xlu1 %2836  ;;  %v2888_v21 = vrot.slane %v2856_v37, 5 }
0x164a   :  { %v2857_v52 = vmul.f32 %v4868_v41, %v2837_v51  ;;  %v2839_v53 = vpop.permute.xlu0 %2838 }
0x164b   :  { %v2858_v28 = vmul.f32 %v4871_v30, %v2839_v53  ;;  %v2912_v19 = vsel %vm512_vm2, %v2911_v40, %v2910_v18 }
0x164c   :  { %v2913_v56 = vrot.slane %v2857_v52, 5  ;;  %v2890_v12 = vrot.slane %v2857_v52, 4 }
0x164d   :  { %v2915_v10 = vrot.slane %v2858_v28, 4  ;;  %v2841_v62 = vpop.permute.xlu1 %2840 }
0x164e   :  { %v2914_v2 = vsel %vm515_vm3, %v2913_v56, %v2912_v19  ;;  %v2859_v20 = vmul.f32 %v4876_v9, %v2841_v62  ;;  %v2843_v61 = vpop.permute.xlu0 %2842 }
0x164f   :  { %v2860_v5 = vmul.f32 %v4879_v1, %v2843_v61  ;;  %v2916_v17 = vsel %vm518_vm4, %v2915_v10, %v2914_v2 }
0x1650   :  { %v2917_v3 = vrot.slane %v2859_v20, 3  ;;  %v2894_v42 = vrot.slane %v2859_v20, 2 }
0x1651   :  { %v2919_v27 = vrot.slane %v2860_v5, 2  ;;  %v2845_v41 = vpop.permute.xlu1 %2844  ;;  %v2896_v11 = vrot.slane %v2860_v5, 1 }
0x1652   :  { %v2918_v23 = vsel %vm521_vm5, %v2917_v3, %v2916_v17  ;;  %v2861_v30 = vmul.f32 %v4884_v33, %v2845_v41  ;;  %v2831_v0 = vpop.permute.xlu0 %2830  ;;  %v2892_v33 = vrot.slane %v2858_v28, 3 }
0x1653   :  { %v2854_v45 = vmul.f32 %v4887_v44, %v2831_v0  ;;  %v2920_v1 = vsel %vm524_vm6, %v2919_v27, %v2918_v23 }
0x1654   :  { %v2921_v58 = vrot.slane %v2861_v30, 1 }
0x1655   :  { %v2885_v22 = vrot.slane %v2854_v45, 7  ;;  %2923 = vrot.lane.b32.xlu1 %v2854_v45, %s3876_s30  ;;  %v2864_v9 = vpop.permute.xlu1 %2863 }
0x1656   :  { %v2872_v7 = vpop.permute.xlu0 %2871  ;;  %v2922_v24 = vsel %vm527_vm7, %v2921_v58, %v2920_v1  ;;  %v2900_v46 = vsel %vm80_vm1, %v4117_v55, %v2864_v9 }
0x1657   :  { %v2887_v32 = vsel %vm512_vm2, %v2886_v38, %v2885_v22  ;;  %2925 = vrot.lane.b32.xlu0 %v2922_v24, %s3876_s30  ;;  %v2905_v16 = vsel %vm80_vm1, %v4604_v49, %v2872_v7 }
0x1658   :  { %v2889_v44 = vsel %vm515_vm3, %v2888_v21, %v2887_v32 }
0x1659   :  { %v2891_v31 = vsel %vm518_vm4, %v2890_v12, %v2889_v44  ;;  %v2867_v63 = vpop.permute.xlu1 %2866 }
0x165a   :  { %v2902_v48 = vsel %vm2901_vm9, %v2900_v46, %v2867_v63  ;;  %v2893_v8 = vsel %vm521_vm5, %v2892_v33, %v2891_v31  ;;  %v2875_v60 = vpop.permute.xlu0 %2874 }
0x165b   :  { %v2904_v6 = vsel %vm2903_vm10, %v2902_v48, %v4482_v36  ;;  %v2895_v15 = vsel %vm524_vm6, %v2894_v42, %v2893_v8  ;;  %v2906_v35 = vsel %vm2901_vm9, %v2905_v16, %v2875_v60 }
0x165c   :  { %2908 = vst [vmem:[%s4977_s4] sm:$0xff] %v2904_v6  ;;  %v2897_v55 = vsel %vm527_vm7, %v2896_v11, %v2895_v15 }
0x165d   :  { %v2898_v14 = vsel %vm530_vm8, %v2861_v30, %v2897_v55 }
0x165e   :  { %v2907_v13 = vsel %vm2903_vm10, %v2906_v35, %v2898_v14 }
0x165f   :  { %2909 = vst [vmem:[%s4977_s4 + $0x8] sm:$0xff] %v2907_v13 }
0x16c7   :  { %v2924_v36 = vpop.permute.xlu1 %2923 }
0x16c8   :  { %2930 = vst.msk [vmem:[#allocation8 - $0x7] sm:$0x80] %vm2929_vm11, %v2924_v36 }
0x16c9   :  { %v2926_v49 = vpop.permute.xlu0 %2925 }
0x16ca   :  { %2932 = vst.msk [vmem:[#allocation8 + $0x1] sm:$0x7f] %vm2931_vm12, %v2926_v49 }
0x16cb   :  { %3850 = shalt.err (!%p3847_p0)
}
0x16cc   :  { %s3851_s4 = scalar_lea.hbm %s4978_s5, 128 }
0x16cd   :  { %p3852_p1 = scmp.ne.s32.totalorder %s4978_s5, %s3851_s4  ;;  %p3855_p2 = scmp.lt.u32.totalorder %s3851_s4, %s4978_s5 }
0x16cf   :  { %p3857_p3 = pnand %p3855_p2, %p3852_p1 }
0x16d1   :  { %3860 = shalt.err (!%p3857_p3)
}
0x16d2   :  { %2944 = dma.vmem_to_hbm [thread:$0]  %s2942_s12, 128, %s4978_s5, [#allocation4]  }
0x16d3   :  { %3865 = dma.done.wait [#allocation4], 128  }
0x16d4   :  { %3866 = vsyncadd [#allocation4], 4294967168 }
0x16d5   :  { %2950 = vsyncpa [#allocation3], 1 }
0x16d6   :  { %2951 = vsyncpa [#allocation6], 1 }
0x16d7   :  { %2952 = vsyncpa [#allocation4], 1 }

</bundles_post_ra>
